<compile_context>
chip_gen: v6e
topology: v6e:2x2x1
jax: 0.10.0
libtpu: 0.0.40
codegen_flags: <defaults>
</compile_context>

<pallas_src>
import functools

import jax
import jax.numpy as jnp
from jax.experimental import pallas as pl
from jax.experimental.pallas import tpu as pltpu

BN_EPS = 1e-3   # EfficientNetV2 uses BatchNorm2d(eps=1e-3)
LANE = 128      # TPU lane width


def _round_up_lanes(c):
    return ((c + LANE - 1) // LANE) * LANE


# ---------------------------------------------------------------------------
# Fused MBConv Pallas kernel
# ---------------------------------------------------------------------------
def _mbconv_fused_kernel(x_ref, we_ref, be_ref, wd_ref, bd_ref, wp_ref, bp_ref,
                         o_ref, e_ref, *, K, stride, pad, H, W, Wout, tile_h,
                         has_shortcut):
    """One MBConv block for one batch image, tiled over output rows.

    x_ref : (1, H, W, Cin_p)          input image (resident across the row-tile axis)
    we_ref: (Cin_p, Cexp_p)           expand 1x1 weight (BN scale folded in)
    be_ref: (1, Cexp_p)               expand BN bias
    wd_ref: (K*K, Cexp_p)             depthwise weight (BN scale folded), row = dy*K+dx
    bd_ref: (1, Cexp_p)               depthwise BN bias
    wp_ref: (Cexp_p, Cout_p)          project 1x1 weight (BN scale folded in)
    bp_ref: (1, Cout_p)               project BN bias
    o_ref : (1, tile_h, Wout, Cout_p) output row tile
    e_ref : (Hp, Wp, Cexp_p) f32      VMEM scratch: spatially zero-padded expanded act.
    """
    j = pl.program_id(1)
    cin_p = x_ref.shape[-1]
    cexp_p = e_ref.shape[-1]
    cout_p = o_ref.shape[-1]
    cdt = we_ref.dtype   # MXU compute dtype (float32 or bfloat16)

    # ---- stage 1 (once per image): expand 1x1 conv + BN + SiLU into padded scratch.
    @pl.when(j == 0)
    def _():
        e_ref[...] = jnp.zeros_like(e_ref)          # 'same'-padding border stays zero
        x2 = x_ref[...].reshape(H * W, cin_p).astype(cdt)
        y = jnp.dot(x2, we_ref[...], preferred_element_type=jnp.float32)
        y = y + be_ref[...]
        y = y * jax.nn.sigmoid(y)                   # SiLU
        e_ref[pl.ds(pad, H), pl.ds(pad, W), :] = y.reshape(H, W, cexp_p)

    # ---- stage 2: depthwise KxK conv + BN + SiLU for output rows [j*tile_h, (j+1)*tile_h).
    h0 = j * (tile_h * stride)                      # first padded input row of this tile
    acc = jnp.zeros((tile_h, Wout, cexp_p), jnp.float32)
    for dy in range(K):
        for dx in range(K):
            if stride == 1:
                patch = e_ref[pl.ds(h0 + dy, tile_h), pl.ds(dx, Wout), :]
            else:  # stride 2: strided window read straight from the scratch ref
                patch = e_ref[pl.ds(h0 + dy, tile_h, stride),
                              pl.ds(dx, Wout, stride), :]
            acc = acc + patch * wd_ref[dy * K + dx, :]
    y = acc + bd_ref[...]
    y = y * jax.nn.sigmoid(y)                       # SiLU

    # TODO(synk): `msa(expanded_c)` is referenced by MBConv but its definition is not
    # provided in network/efficientv2_msa.py; treated as identity here.

    # ---- stage 3: project 1x1 conv + BN (Identity activation) + residual.
    z = jnp.dot(y.reshape(tile_h * Wout, cexp_p).astype(cdt), wp_ref[...],
                preferred_element_type=jnp.float32)
    z = z + bp_ref[...]
    if has_shortcut:  # stride == 1 -> Wout == W and Cout_p == Cin_p
        res = x_ref[0, pl.ds(j * tile_h, tile_h), :, :]
        z = z + res.reshape(tile_h * W, cin_p).astype(jnp.float32)
    o_ref[...] = z.reshape(1, tile_h, Wout, cout_p).astype(o_ref.dtype)


# ---------------------------------------------------------------------------
# Wrappers
# ---------------------------------------------------------------------------
def _pick_tile_h(hout, wout):
    """Largest divisor of hout whose tile holds at most ~2048 output rows."""
    target = max(1, 2048 // max(wout, 1))
    best = 1
    for d in range(1, hout + 1):
        if hout % d == 0 and d <= target:
            best = d
    return best


def mbconv_forward_nhwc(x_nhwc, params, *, stride, tile_h=None,
                        compute_dtype=jnp.float32, drop_rate=0.0, training=False):
    """Fused MBConv forward (eval mode) on NHWC input. Returns NHWC output."""
    assert stride in (1, 2), "Illegal stride value."
    # DropPath(drop_rate) is identity in eval mode, matching drop_path(x, p, False).
    del drop_rate, training

    N, H, W, Cin = x_nhwc.shape
    K = params["w_dw"].shape[0]
    Cexp = params["w_exp"].shape[1]
    Cout = params["w_proj"].shape[1]
    pad = (K - 1) // 2
    Hout = (H + 2 * pad - K) // stride + 1
    Wout = (W + 2 * pad - K) // stride + 1
    Hp, Wp = H + 2 * pad, W + 2 * pad
    has_shortcut = (stride == 1) and (Cin == Cout)

    # Lane-dense channel padding (zeros) so every matmul / store uses full 128-lane tiles.
    Cin_p, Cexp_p, Cout_p = map(_round_up_lanes, (Cin, Cexp, Cout))

    # Fold the eval-mode BN scale into the conv weights; only the bias stays in-kernel.
    we = jnp.pad(params["w_exp"] * params["s_exp"][None, :],
                 ((0, Cin_p - Cin), (0, Cexp_p - Cexp))).astype(compute_dtype)
    be = jnp.pad(params["b_exp"], (0, Cexp_p - Cexp)).reshape(1, Cexp_p).astype(jnp.float32)
    wd = jnp.pad(params["w_dw"] * params["s_dw"][None, None, :],
                 ((0, 0), (0, 0), (0, Cexp_p - Cexp))).reshape(K * K, Cexp_p).astype(jnp.float32)
    bd = jnp.pad(params["b_dw"], (0, Cexp_p - Cexp)).reshape(1, Cexp_p).astype(jnp.float32)
    wp = jnp.pad(params["w_proj"] * params["s_proj"][None, :],
                 ((0, Cexp_p - Cexp), (0, Cout_p - Cout))).astype(compute_dtype)
    bp = jnp.pad(params["b_proj"], (0, Cout_p - Cout)).reshape(1, Cout_p).astype(jnp.float32)
    xp = jnp.pad(x_nhwc, ((0, 0), (0, 0), (0, 0), (0, Cin_p - Cin)))

    if tile_h is None:
        tile_h = _pick_tile_h(Hout, Wout)
    assert Hout % tile_h == 0, "tile_h must divide the output height"
    n_tiles = Hout // tile_h

    kernel = functools.partial(
        _mbconv_fused_kernel, K=K, stride=stride, pad=pad, H=H, W=W, Wout=Wout,
        tile_h=tile_h, has_shortcut=has_shortcut)

    # Rough VMEM budget: double-buffered blocks + resident expanded-activation scratch.
    cbytes = jnp.dtype(compute_dtype).itemsize
    est = (2 * H * W * Cin_p * 4
           + Hp * Wp * Cexp_p * 4
           + 2 * tile_h * Wout * Cout_p * 4
           + 2 * (Cin_p * Cexp_p + Cexp_p * Cout_p) * cbytes
           + 2 * (K * K + 3) * Cexp_p * 4)
    vmem_limit = int(min(48 * 2**20, max(32 * 2**20, 2 * est)))  # keep below v7x's 64 MiB

    out = pl.pallas_call(
        kernel,
        out_shape=jax.ShapeDtypeStruct((N, Hout, Wout, Cout_p), x_nhwc.dtype),
        grid=(N, n_tiles),
        in_specs=[
            pl.BlockSpec((1, H, W, Cin_p), lambda n, j: (n, 0, 0, 0)),  # resident over j
            pl.BlockSpec((Cin_p, Cexp_p), lambda n, j: (0, 0)),
            pl.BlockSpec((1, Cexp_p), lambda n, j: (0, 0)),
            pl.BlockSpec((K * K, Cexp_p), lambda n, j: (0, 0)),
            pl.BlockSpec((1, Cexp_p), lambda n, j: (0, 0)),
            pl.BlockSpec((Cexp_p, Cout_p), lambda n, j: (0, 0)),
            pl.BlockSpec((1, Cout_p), lambda n, j: (0, 0)),
        ],
        out_specs=pl.BlockSpec((1, tile_h, Wout, Cout_p), lambda n, j: (n, j, 0, 0)),
        scratch_shapes=[pltpu.VMEM((Hp, Wp, Cexp_p), jnp.float32)],
        compiler_params=pltpu.CompilerParams(
            dimension_semantics=("parallel", "arbitrary"),
            vmem_limit_bytes=vmem_limit),
    )(xp, we, be, wd, bd, wp, bp)
    return out[..., :Cout]


def mbconv_forward(x_nchw, params, *, stride, tile_h=None,
                   compute_dtype=jnp.float32, drop_rate=0.0, training=False):
    # NOTE: in a full network, keep activations NHWC and call mbconv_forward_nhwc
    # directly; these transposes exist only to match the PyTorch NCHW interface.
    x = jnp.transpose(x_nchw, (0, 2, 3, 1))
    y = mbconv_forward_nhwc(x, params, stride=stride, tile_h=tile_h,
                            compute_dtype=compute_dtype,
                            drop_rate=drop_rate, training=training)
    return jnp.transpose(y, (0, 3, 1, 2))


# ---------------------------------------------------------------------------
# Parameter construction (deterministic, synthetic) and pure-JAX reference
# ---------------------------------------------------------------------------
def _fold_bn(key, c):
    k1, k2, k3, k4 = jax.random.split(key, 4)
    gamma = jax.random.uniform(k1, (c,), minval=0.5, maxval=1.5)
    beta = 0.1 * jax.random.normal(k2, (c,))
    running_mean = 0.1 * jax.random.normal(k3, (c,))
    running_var = jax.random.uniform(k4, (c,), minval=0.5, maxval=1.5)
    scale = gamma / jnp.sqrt(running_var + BN_EPS)
    bias = beta - running_mean * scale
    return scale.astype(jnp.float32), bias.astype(jnp.float32)


def init_mbconv_params(key, kernel_size, input_c, out_c, expand_ratio):
    assert expand_ratio != 1
    expanded_c = input_c * expand_ratio
    ks = jax.random.split(key, 6)
    w_exp = (jax.random.normal(ks[0], (input_c, expanded_c)) /
             jnp.sqrt(float(input_c))).astype(jnp.float32)
    s_exp, b_exp = _fold_bn(ks[1], expanded_c)
    w_dw = (jax.random.normal(ks[2], (kernel_size, kernel_size, expanded_c)) /
            float(kernel_size)).astype(jnp.float32)
    s_dw, b_dw = _fold_bn(ks[3], expanded_c)
    w_proj = (jax.random.normal(ks[4], (expanded_c, out_c)) /
              jnp.sqrt(float(expanded_c))).astype(jnp.float32)
    s_proj, b_proj = _fold_bn(ks[5], out_c)
    return dict(w_exp=w_exp, s_exp=s_exp, b_exp=b_exp,
                w_dw=w_dw, s_dw=s_dw, b_dw=b_dw,
                w_proj=w_proj, s_proj=s_proj, b_proj=b_proj)


def mbconv_reference(x_nchw, params, *, stride):
    def silu(v):
        return v * jax.nn.sigmoid(v)

    x = jnp.transpose(x_nchw, (0, 2, 3, 1))
    h = silu(jnp.einsum("nhwc,co->nhwo", x, params["w_exp"])
             * params["s_exp"] + params["b_exp"])
    K = params["w_dw"].shape[0]
    C = params["w_dw"].shape[-1]
    pad = (K - 1) // 2
    wd = params["w_dw"][:, :, None, :]  # (K, K, 1, C) HWIO
    h = jax.lax.conv_general_dilated(
        h, wd, window_strides=(stride, stride),
        padding=[(pad, pad), (pad, pad)],
        dimension_numbers=("NHWC", "HWIO", "NHWC"),
        feature_group_count=C)
    h = silu(h * params["s_dw"] + params["b_dw"])
    h = (jnp.einsum("nhwc,co->nhwo", h, params["w_proj"])
         * params["s_proj"] + params["b_proj"])
    if stride == 1 and x.shape[-1] == h.shape[-1]:
        h = h + x
    return jnp.transpose(h, (0, 3, 1, 2))


# ---------------------------------------------------------------------------
if __name__ == "__main__":
    key = jax.random.PRNGKey(0)

    # Test 1: toy MBConv config (stride=1 -> shortcut), f32 MXU path, 4 row tiles.
    N, Cin, H, W = 2, 4, 16, 16
    kernel_size, out_c, expand_ratio, stride = 3, 4, 4, 1
    params = init_mbconv_params(key, kernel_size, Cin, out_c, expand_ratio)
    x = jax.random.normal(jax.random.fold_in(key, 99), (N, Cin, H, W), jnp.float32)

    y = mbconv_forward(x, params, stride=stride, tile_h=4,
                       compute_dtype=jnp.float32, drop_rate=0.2, training=False)
    y = jax.block_until_ready(y)
    y_ref = mbconv_reference(x, params, stride=stride)
    assert y.shape == (N, out_c, H, W), y.shape
    assert jnp.allclose(y, y_ref, atol=1e-3, rtol=1e-3), "f32 mismatch vs JAX reference"

    # Test 2: wider channels / larger spatial so the lane-dense multi-tile and bf16
    # MXU paths are actually exercised (Cexp = 192 -> padded to 256, 4 row tiles).
    N2, Cin2, H2, W2, out_c2 = 2, 48, 32, 32, 48
    params2 = init_mbconv_params(jax.random.fold_in(key, 7), 3, Cin2, out_c2, 4)
    x2 = jax.random.normal(jax.random.fold_in(key, 8), (N2, Cin2, H2, W2), jnp.float32)
    y2 = mbconv_forward(x2, params2, stride=1, tile_h=8, compute_dtype=jnp.bfloat16)
    y2 = jax.block_until_ready(y2)
    y2_ref = mbconv_reference(x2, params2, stride=1)
    assert y2.shape == (N2, out_c2, H2, W2), y2.shape
    assert jnp.allclose(y2, y2_ref, atol=1e-1, rtol=5e-2), "bf16 mismatch vs JAX reference"

    print("KERNEL_OK")
</pallas_src>

<mosaic_0001>
module attributes {stable_mosaic.version = 11 : i64} {
  func.func @_mbconv_fused_kernel(%arg0: i32, %arg1: i32, %arg2: memref<1x16x16x128xf32, #tpu.memory_space<vmem>>, %arg3: memref<128x128xf32, #tpu.memory_space<vmem>>, %arg4: memref<1x128xf32, #tpu.memory_space<vmem>>, %arg5: memref<9x128xf32, #tpu.memory_space<vmem>>, %arg6: memref<1x128xf32, #tpu.memory_space<vmem>>, %arg7: memref<128x128xf32, #tpu.memory_space<vmem>>, %arg8: memref<1x128xf32, #tpu.memory_space<vmem>>, %arg9: memref<1x4x16x128xf32, #tpu.memory_space<vmem>>, %arg10: memref<18x18x128xf32, #tpu.memory_space<vmem>>) attributes {dimension_semantics = [#tpu.dimension_semantics<parallel>, #tpu.dimension_semantics<arbitrary>], iteration_bounds = array<i64: 2, 4>, scalar_prefetch = 0 : i64, scratch_operands = 1 : i64, tpu.core_type = #tpu.core_type<tc>, window_params = [{transform_indices = @transform_0, window_bounds = array<i64: 1, 16, 16, 128>}, {pipeline_mode = #tpu.pipeline_mode<synchronous>, transform_indices = @transform_1, window_bounds = array<i64: 128, 128>}, {pipeline_mode = #tpu.pipeline_mode<synchronous>, transform_indices = @transform_2, window_bounds = array<i64: 1, 128>}, {pipeline_mode = #tpu.pipeline_mode<synchronous>, transform_indices = @transform_3, window_bounds = array<i64: 9, 128>}, {pipeline_mode = #tpu.pipeline_mode<synchronous>, transform_indices = @transform_4, window_bounds = array<i64: 1, 128>}, {pipeline_mode = #tpu.pipeline_mode<synchronous>, transform_indices = @transform_5, window_bounds = array<i64: 128, 128>}, {pipeline_mode = #tpu.pipeline_mode<synchronous>, transform_indices = @transform_6, window_bounds = array<i64: 1, 128>}, {transform_indices = @transform_7, window_bounds = array<i64: 1, 4, 16, 128>}]} {
    %c0_i32 = arith.constant 0 : i32
    %0 = arith.cmpi eq, %arg1, %c0_i32 : i32
    %1 = arith.extui %0 : i1 to i32
    %c0_i32_0 = arith.constant 0 : i32
    %2 = arith.cmpi ne, %1, %c0_i32_0 : i32
    scf.if %2 {
      %cst_51 = arith.constant 0.000000e+00 : f32
      %110 = vector.broadcast %cst_51 : f32 to vector<18x18x128xf32>
      %c0_52 = arith.constant 0 : index
      %c0_53 = arith.constant 0 : index
      %c0_54 = arith.constant 0 : index
      %111 = vector.load %arg10[%c0_52, %c0_53, %c0_54] : memref<18x18x128xf32, #tpu.memory_space<vmem>>, vector<18x18x128xf32>
      tpu.vector_store %arg10[%c0_52, %c0_53, %c0_54], %110 {strides = array<i32>} : memref<18x18x128xf32, #tpu.memory_space<vmem>>, vector<18x18x128xf32>,
      %c0_55 = arith.constant 0 : index
      %c0_56 = arith.constant 0 : index
      %c0_57 = arith.constant 0 : index
      %c0_58 = arith.constant 0 : index
      %112 = vector.load %arg2[%c0_55, %c0_56, %c0_57, %c0_58] : memref<1x16x16x128xf32, #tpu.memory_space<vmem>>, vector<1x16x16x128xf32>
      %113 = vector.shape_cast %112 : vector<1x16x16x128xf32> to vector<256x128xf32>
      %c0_59 = arith.constant 0 : index
      %c0_60 = arith.constant 0 : index
      %114 = vector.load %arg3[%c0_59, %c0_60] : memref<128x128xf32, #tpu.memory_space<vmem>>, vector<128x128xf32>
      %cst_61 = arith.constant dense<0.000000e+00> : vector<256x128xf32>
      %115 = tpu.matmul %113, %114, %cst_61 {dimension_numbers = #tpu.dot_dimension_numbers<[1], [0], [0], [1], [0, 0, 1, 1], [], []>} : vector<256x128xf32>, vector<128x128xf32>, vector<256x128xf32> -> vector<256x128xf32>
      %c0_62 = arith.constant 0 : index
      %c0_63 = arith.constant 0 : index
      %116 = vector.load %arg4[%c0_62, %c0_63] : memref<1x128xf32, #tpu.memory_space<vmem>>, vector<1x128xf32>
      %117 = vector.broadcast %116 : vector<1x128xf32> to vector<256x128xf32>
      %118 = arith.addf %115, %117 : vector<256x128xf32>
      %119 = arith.negf %118 : vector<256x128xf32>
      %120 = math.exp %119 : vector<256x128xf32>
      %cst_64 = arith.constant 1.000000e+00 : f32
      %121 = vector.broadcast %cst_64 : f32 to vector<256x128xf32>
      %122 = arith.addf %121, %120 : vector<256x128xf32>
      %123 = arith.divf %121, %122 : vector<256x128xf32>
      %124 = arith.mulf %118, %123 : vector<256x128xf32>
      %125 = vector.shape_cast %124 : vector<256x128xf32> to vector<16x16x128xf32>
      %c1_65 = arith.constant 1 : index
      %c1_66 = arith.constant 1 : index
      %c0_67 = arith.constant 0 : index
      %126 = vector.load %arg10[%c1_65, %c1_66, %c0_67] : memref<18x18x128xf32, #tpu.memory_space<vmem>>, vector<16x16x128xf32>
      tpu.vector_store %arg10[%c1_65, %c1_66, %c0_67], %125 {strides = array<i32>} : memref<18x18x128xf32, #tpu.memory_space<vmem>>, vector<16x16x128xf32>,
    } else {
    }
    %c4_i32 = arith.constant 4 : i32
    %3 = arith.muli %arg1, %c4_i32 : i32
    %cst = arith.constant 0.000000e+00 : f32
    %4 = vector.broadcast %cst : f32 to vector<4x16x128xf32>
    %c0_i32_1 = arith.constant 0 : i32
    %5 = arith.addi %3, %c0_i32_1 : i32
    %6 = arith.index_cast %5 : i32 to index
    %c0 = arith.constant 0 : index
    %c0_2 = arith.constant 0 : index
    %7 = vector.load %arg10[%6, %c0, %c0_2] : memref<18x18x128xf32, #tpu.memory_space<vmem>>, vector<4x16x128xf32>
    %c0_3 = arith.constant 0 : index
    %c0_4 = arith.constant 0 : index
    %8 = vector.load %arg5[%c0_3, %c0_4] : memref<9x128xf32, #tpu.memory_space<vmem>>, vector<1x128xf32>
    %9 = vector.shape_cast %8 : vector<1x128xf32> to vector<128xf32>
    %10 = vector.shape_cast %9 : vector<128xf32> to vector<1x1x128xf32>
    %11 = vector.broadcast %10 : vector<1x1x128xf32> to vector<4x16x128xf32>
    %12 = arith.mulf %7, %11 : vector<4x16x128xf32>
    %13 = arith.addf %4, %12 : vector<4x16x128xf32>
    %c0_i32_5 = arith.constant 0 : i32
    %14 = arith.addi %3, %c0_i32_5 : i32
    %15 = arith.index_cast %14 : i32 to index
    %c1 = arith.constant 1 : index
    %c0_6 = arith.constant 0 : index
    %16 = vector.load %arg10[%15, %c1, %c0_6] : memref<18x18x128xf32, #tpu.memory_space<vmem>>, vector<4x16x128xf32>
    %c1_7 = arith.constant 1 : index
    %c0_8 = arith.constant 0 : index
    %17 = vector.load %arg5[%c1_7, %c0_8] : memref<9x128xf32, #tpu.memory_space<vmem>>, vector<1x128xf32>
    %18 = vector.shape_cast %17 : vector<1x128xf32> to vector<128xf32>
    %19 = vector.shape_cast %18 : vector<128xf32> to vector<1x1x128xf32>
    %20 = vector.broadcast %19 : vector<1x1x128xf32> to vector<4x16x128xf32>
    %21 = arith.mulf %16, %20 : vector<4x16x128xf32>
    %22 = arith.addf %13, %21 : vector<4x16x128xf32>
    %c0_i32_9 = arith.constant 0 : i32
    %23 = arith.addi %3, %c0_i32_9 : i32
    %24 = arith.index_cast %23 : i32 to index
    %c2 = arith.constant 2 : index
    %c0_10 = arith.constant 0 : index
    %25 = vector.load %arg10[%24, %c2, %c0_10] : memref<18x18x128xf32, #tpu.memory_space<vmem>>, vector<4x16x128xf32>
    %c2_11 = arith.constant 2 : index
    %c0_12 = arith.constant 0 : index
    %26 = vector.load %arg5[%c2_11, %c0_12] : memref<9x128xf32, #tpu.memory_space<vmem>>, vector<1x128xf32>
    %27 = vector.shape_cast %26 : vector<1x128xf32> to vector<128xf32>
    %28 = vector.shape_cast %27 : vector<128xf32> to vector<1x1x128xf32>
    %29 = vector.broadcast %28 : vector<1x1x128xf32> to vector<4x16x128xf32>
    %30 = arith.mulf %25, %29 : vector<4x16x128xf32>
    %31 = arith.addf %22, %30 : vector<4x16x128xf32>
    %c1_i32 = arith.constant 1 : i32
    %32 = arith.addi %3, %c1_i32 : i32
    %33 = arith.index_cast %32 : i32 to index
    %c0_13 = arith.constant 0 : index
    %c0_14 = arith.constant 0 : index
    %34 = vector.load %arg10[%33, %c0_13, %c0_14] : memref<18x18x128xf32, #tpu.memory_space<vmem>>, vector<4x16x128xf32>
    %c3 = arith.constant 3 : index
    %c0_15 = arith.constant 0 : index
    %35 = vector.load %arg5[%c3, %c0_15] : memref<9x128xf32, #tpu.memory_space<vmem>>, vector<1x128xf32>
    %36 = vector.shape_cast %35 : vector<1x128xf32> to vector<128xf32>
    %37 = vector.shape_cast %36 : vector<128xf32> to vector<1x1x128xf32>
    %38 = vector.broadcast %37 : vector<1x1x128xf32> to vector<4x16x128xf32>
    %39 = arith.mulf %34, %38 : vector<4x16x128xf32>
    %40 = arith.addf %31, %39 : vector<4x16x128xf32>
    %c1_i32_16 = arith.constant 1 : i32
    %41 = arith.addi %3, %c1_i32_16 : i32
    %42 = arith.index_cast %41 : i32 to index
    %c1_17 = arith.constant 1 : index
    %c0_18 = arith.constant 0 : index
    %43 = vector.load %arg10[%42, %c1_17, %c0_18] : memref<18x18x128xf32, #tpu.memory_space<vmem>>, vector<4x16x128xf32>
    %c4 = arith.constant 4 : index
    %c0_19 = arith.constant 0 : index
    %44 = vector.load %arg5[%c4, %c0_19] : memref<9x128xf32, #tpu.memory_space<vmem>>, vector<1x128xf32>
    %45 = vector.shape_cast %44 : vector<1x128xf32> to vector<128xf32>
    %46 = vector.shape_cast %45 : vector<128xf32> to vector<1x1x128xf32>
    %47 = vector.broadcast %46 : vector<1x1x128xf32> to vector<4x16x128xf32>
    %48 = arith.mulf %43, %47 : vector<4x16x128xf32>
    %49 = arith.addf %40, %48 : vector<4x16x128xf32>
    %c1_i32_20 = arith.constant 1 : i32
    %50 = arith.addi %3, %c1_i32_20 : i32
    %51 = arith.index_cast %50 : i32 to index
    %c2_21 = arith.constant 2 : index
    %c0_22 = arith.constant 0 : index
    %52 = vector.load %arg10[%51, %c2_21, %c0_22] : memref<18x18x128xf32, #tpu.memory_space<vmem>>, vector<4x16x128xf32>
    %c5 = arith.constant 5 : index
    %c0_23 = arith.constant 0 : index
    %53 = vector.load %arg5[%c5, %c0_23] : memref<9x128xf32, #tpu.memory_space<vmem>>, vector<1x128xf32>
    %54 = vector.shape_cast %53 : vector<1x128xf32> to vector<128xf32>
    %55 = vector.shape_cast %54 : vector<128xf32> to vector<1x1x128xf32>
    %56 = vector.broadcast %55 : vector<1x1x128xf32> to vector<4x16x128xf32>
    %57 = arith.mulf %52, %56 : vector<4x16x128xf32>
    %58 = arith.addf %49, %57 : vector<4x16x128xf32>
    %c2_i32 = arith.constant 2 : i32
    %59 = arith.addi %3, %c2_i32 : i32
    %60 = arith.index_cast %59 : i32 to index
    %c0_24 = arith.constant 0 : index
    %c0_25 = arith.constant 0 : index
    %61 = vector.load %arg10[%60, %c0_24, %c0_25] : memref<18x18x128xf32, #tpu.memory_space<vmem>>, vector<4x16x128xf32>
    %c6 = arith.constant 6 : index
    %c0_26 = arith.constant 0 : index
    %62 = vector.load %arg5[%c6, %c0_26] : memref<9x128xf32, #tpu.memory_space<vmem>>, vector<1x128xf32>
    %63 = vector.shape_cast %62 : vector<1x128xf32> to vector<128xf32>
    %64 = vector.shape_cast %63 : vector<128xf32> to vector<1x1x128xf32>
    %65 = vector.broadcast %64 : vector<1x1x128xf32> to vector<4x16x128xf32>
    %66 = arith.mulf %61, %65 : vector<4x16x128xf32>
    %67 = arith.addf %58, %66 : vector<4x16x128xf32>
    %c2_i32_27 = arith.constant 2 : i32
    %68 = arith.addi %3, %c2_i32_27 : i32
    %69 = arith.index_cast %68 : i32 to index
    %c1_28 = arith.constant 1 : index
    %c0_29 = arith.constant 0 : index
    %70 = vector.load %arg10[%69, %c1_28, %c0_29] : memref<18x18x128xf32, #tpu.memory_space<vmem>>, vector<4x16x128xf32>
    %c7 = arith.constant 7 : index
    %c0_30 = arith.constant 0 : index
    %71 = vector.load %arg5[%c7, %c0_30] : memref<9x128xf32, #tpu.memory_space<vmem>>, vector<1x128xf32>
    %72 = vector.shape_cast %71 : vector<1x128xf32> to vector<128xf32>
    %73 = vector.shape_cast %72 : vector<128xf32> to vector<1x1x128xf32>
    %74 = vector.broadcast %73 : vector<1x1x128xf32> to vector<4x16x128xf32>
    %75 = arith.mulf %70, %74 : vector<4x16x128xf32>
    %76 = arith.addf %67, %75 : vector<4x16x128xf32>
    %c2_i32_31 = arith.constant 2 : i32
    %77 = arith.addi %3, %c2_i32_31 : i32
    %78 = arith.index_cast %77 : i32 to index
    %c2_32 = arith.constant 2 : index
    %c0_33 = arith.constant 0 : index
    %79 = vector.load %arg10[%78, %c2_32, %c0_33] : memref<18x18x128xf32, #tpu.memory_space<vmem>>, vector<4x16x128xf32>
    %c8 = arith.constant 8 : index
    %c0_34 = arith.constant 0 : index
    %80 = vector.load %arg5[%c8, %c0_34] : memref<9x128xf32, #tpu.memory_space<vmem>>, vector<1x128xf32>
    %81 = vector.shape_cast %80 : vector<1x128xf32> to vector<128xf32>
    %82 = vector.shape_cast %81 : vector<128xf32> to vector<1x1x128xf32>
    %83 = vector.broadcast %82 : vector<1x1x128xf32> to vector<4x16x128xf32>
    %84 = arith.mulf %79, %83 : vector<4x16x128xf32>
    %85 = arith.addf %76, %84 : vector<4x16x128xf32>
    %c0_35 = arith.constant 0 : index
    %c0_36 = arith.constant 0 : index
    %86 = vector.load %arg6[%c0_35, %c0_36] : memref<1x128xf32, #tpu.memory_space<vmem>>, vector<1x128xf32>
    %87 = vector.shape_cast %86 : vector<1x128xf32> to vector<1x1x128xf32>
    %88 = vector.broadcast %87 : vector<1x1x128xf32> to vector<4x16x128xf32>
    %89 = arith.addf %85, %88 : vector<4x16x128xf32>
    %90 = arith.negf %89 : vector<4x16x128xf32>
    %91 = math.exp %90 : vector<4x16x128xf32>
    %cst_37 = arith.constant 1.000000e+00 : f32
    %92 = vector.broadcast %cst_37 : f32 to vector<4x16x128xf32>
    %93 = arith.addf %92, %91 : vector<4x16x128xf32>
    %94 = arith.divf %92, %93 : vector<4x16x128xf32>
    %95 = arith.mulf %89, %94 : vector<4x16x128xf32>
    %96 = vector.shape_cast %95 : vector<4x16x128xf32> to vector<64x128xf32>
    %c0_38 = arith.constant 0 : index
    %c0_39 = arith.constant 0 : index
    %97 = vector.load %arg7[%c0_38, %c0_39] : memref<128x128xf32, #tpu.memory_space<vmem>>, vector<128x128xf32>
    %cst_40 = arith.constant dense<0.000000e+00> : vector<64x128xf32>
    %98 = tpu.matmul %96, %97, %cst_40 {dimension_numbers = #tpu.dot_dimension_numbers<[1], [0], [0], [1], [0, 0, 1, 1], [], []>} : vector<64x128xf32>, vector<128x128xf32>, vector<64x128xf32> -> vector<64x128xf32>
    %c0_41 = arith.constant 0 : index
    %c0_42 = arith.constant 0 : index
    %99 = vector.load %arg8[%c0_41, %c0_42] : memref<1x128xf32, #tpu.memory_space<vmem>>, vector<1x128xf32>
    %100 = vector.broadcast %99 : vector<1x128xf32> to vector<64x128xf32>
    %101 = arith.addf %98, %100 : vector<64x128xf32>
    %c4_i32_43 = arith.constant 4 : i32
    %102 = arith.muli %arg1, %c4_i32_43 : i32
    %c0_44 = arith.constant 0 : index
    %103 = arith.index_cast %102 : i32 to index
    %c0_45 = arith.constant 0 : index
    %c0_46 = arith.constant 0 : index
    %104 = vector.load %arg2[%c0_44, %103, %c0_45, %c0_46] : memref<1x16x16x128xf32, #tpu.memory_space<vmem>>, vector<1x4x16x128xf32>
    %105 = vector.shape_cast %104 : vector<1x4x16x128xf32> to vector<4x16x128xf32>
    %106 = vector.shape_cast %105 : vector<4x16x128xf32> to vector<64x128xf32>
    %107 = arith.addf %101, %106 : vector<64x128xf32>
    %108 = vector.shape_cast %107 : vector<64x128xf32> to vector<1x4x16x128xf32>
    %c0_47 = arith.constant 0 : index
    %c0_48 = arith.constant 0 : index
    %c0_49 = arith.constant 0 : index
    %c0_50 = arith.constant 0 : index
    %109 = vector.load %arg9[%c0_47, %c0_48, %c0_49, %c0_50] : memref<1x4x16x128xf32, #tpu.memory_space<vmem>>, vector<1x4x16x128xf32>
    tpu.vector_store %arg9[%c0_47, %c0_48, %c0_49, %c0_50], %108 {strides = array<i32>} : memref<1x4x16x128xf32, #tpu.memory_space<vmem>>, vector<1x4x16x128xf32>,
    return
  }
  func.func @transform_0(%arg0: i32, %arg1: i32) -> (i32, i32, i32, i32) {
    %c0_i32 = arith.constant 0 : i32
    %c0_i32_0 = arith.constant 0 : i32
    %c0_i32_1 = arith.constant 0 : i32
    %c0_i32_2 = arith.constant 0 : i32
    return %arg0, %c0_i32, %c0_i32_0, %c0_i32_1 : i32, i32, i32, i32
  }
  func.func @transform_1(%arg0: i32, %arg1: i32) -> (i32, i32) {
    %c0_i32 = arith.constant 0 : i32
    %c0_i32_0 = arith.constant 0 : i32
    %c0_i32_1 = arith.constant 0 : i32
    return %c0_i32, %c0_i32_0 : i32, i32
  }
  func.func @transform_2(%arg0: i32, %arg1: i32) -> (i32, i32) {
    %c0_i32 = arith.constant 0 : i32
    %c0_i32_0 = arith.constant 0 : i32
    %c0_i32_1 = arith.constant 0 : i32
    return %c0_i32, %c0_i32_0 : i32, i32
  }
  func.func @transform_3(%arg0: i32, %arg1: i32) -> (i32, i32) {
    %c0_i32 = arith.constant 0 : i32
    %c0_i32_0 = arith.constant 0 : i32
    %c0_i32_1 = arith.constant 0 : i32
    return %c0_i32, %c0_i32_0 : i32, i32
  }
  func.func @transform_4(%arg0: i32, %arg1: i32) -> (i32, i32) {
    %c0_i32 = arith.constant 0 : i32
    %c0_i32_0 = arith.constant 0 : i32
    %c0_i32_1 = arith.constant 0 : i32
    return %c0_i32, %c0_i32_0 : i32, i32
  }
  func.func @transform_5(%arg0: i32, %arg1: i32) -> (i32, i32) {
    %c0_i32 = arith.constant 0 : i32
    %c0_i32_0 = arith.constant 0 : i32
    %c0_i32_1 = arith.constant 0 : i32
    return %c0_i32, %c0_i32_0 : i32, i32
  }
  func.func @transform_6(%arg0: i32, %arg1: i32) -> (i32, i32) {
    %c0_i32 = arith.constant 0 : i32
    %c0_i32_0 = arith.constant 0 : i32
    %c0_i32_1 = arith.constant 0 : i32
    return %c0_i32, %c0_i32_0 : i32, i32
  }
  func.func @transform_7(%arg0: i32, %arg1: i32) -> (i32, i32, i32, i32) {
    %c0_i32 = arith.constant 0 : i32
    %c0_i32_0 = arith.constant 0 : i32
    %c0_i32_1 = arith.constant 0 : i32
    return %arg0, %arg1, %c0_i32, %c0_i32_0 : i32, i32, i32, i32
  }
}

</mosaic_0001>

<bundles_post_ra>
// kernel: tpu_custom_call.1
= control target key start
LH: loop header
LB: loop body
LE: loop exit
PB: predicated region body
PF: predicated region fallthrough
CT: control target
= control target key end

     0   :  { %s3334_s0 = inlined_call_operand.hbm [shape: f32[2,16,16,128], index: 0, kind: input, shape index: {}]   ;;  %s3335_s1 = inlined_call_operand.hbm [shape: f32[128,128], index: 1, kind: input, shape index: {}]   ;;  %s3336_s2 = inlined_call_operand.vmem [shape: f32[1,128], index: 2, kind: input, shape index: {}]   ;;  %s3337_s3 = inlined_call_operand.hbm [shape: f32[9,128], index: 3, kind: input, shape index: {}]   ;;  %s3338_s4 = inlined_call_operand.vmem [shape: f32[1,128], index: 4, kind: input, shape index: {}]   ;;  %s3339_s5 = inlined_call_operand.hbm [shape: f32[128,128], index: 5, kind: input, shape index: {}]   ;;  %s3340_s6 = inlined_call_operand.vmem [shape: f32[1,128], index: 6, kind: input, shape index: {}]   ;;  %s3341_s7 = inlined_call_operand.hbm [shape: f32[2,16,16,128], index: 7, kind: output, shape index: {}]  }
   0x1   :  { %3353 = sst [smem:[#allocation23_spill]] %s3335_s1 }
   0x2   :  { %3354 = sst [smem:[#allocation24_spill]] %s3337_s3 }
   0x3   :  { %3355 = sst [smem:[#allocation25_spill]] %s3339_s5 }
   0x4   :  { %3356 = sst [smem:[#allocation26_spill]] %s3341_s7 }
   0x5   :  { %12 = vsyncpa [#allocation4], 0 }
   0x6   :  { %14 = vsyncpa [#allocation4 + $0x1], 0 }
   0x7   :  { %15 = vsyncpa [#allocation7], 0 }
   0x8   :  { %16 = vsyncpa [#allocation10], 0 }
   0x9   :  { %17 = vsyncpa [#allocation5], 0 }
   0xa   :  { %19 = vsyncpa [#allocation5 + $0x1], 0  ;;  %s2569_s24 = smov 0   ;;  %s2571_s25 = smov 0  }
   0xb   :  { %s2573_s26 = smov 0   ;;  %s2575_s27 = smov 0  }
   0xc   :  { %s2577_s28 = smov 0   ;;  %s2579_s29 = smov 0  }
   0xd   :  { %s2581_s30 = smov 0   ;;  %s2583_s8 = smov 0  }
   0xe   :  { %s2585_s9 = smov 0   ;;  %s2587_s10 = smov 0  }
   0xf   :  { %s2589_s11 = smov 0  }
  0x10 LB: > { %3357 = sst [smem:[#allocation16_spill]] %s2477_s24  ;;  %s1591_s12 = sadd.s32 4294967295, %s2517_s11   ;;  %s2517_s11 = sphi %s2589_s11, %s25_s11   ;;  %s2513_s10 = sphi %s2587_s10, %s3395_s10   ;;  %s2509_s9 = sphi %s2585_s9, %s3386_s9   ;;  %s2505_s8 = sphi %s2583_s8, %s3394_s8   ;;  %s2501_s30 = sphi %s2581_s30, %s3385_s30   ;;  %s2497_s29 = sphi %s2579_s29, %s3393_s29   ;;  %s2493_s28 = sphi %s2577_s28, %s3392_s28   ;;  %s2489_s27 = sphi %s2575_s27, %s3391_s27   ;;  %s2485_s26 = sphi %s2573_s26, %s3390_s26   ;;  %s2481_s25 = sphi %s2571_s25, %s3389_s25   ;;  %s2477_s24 = sphi %s2569_s24, %s3388_s24  }
  0x11   : > { %3358 = sst [smem:[#allocation17_spill]] %s2505_s8  ;;  %s1592_s13 = sadd.s32 4294967294, %s2517_s11  }
  0x12   : > { %3359 = sst [smem:[#allocation18_spill]] %s2509_s9  ;;  %p57_p0 = scmp.ne.s32.totalorder %s2493_s28, %s2489_s27 }
  0x13   : > { %p2625_p1 = scmp.eq.s32.totalorder %s1591_s12, 0  ;;  %p208_p2 = scmp.ne.s32.totalorder %s2485_s26, %s2481_s25 }
  0x14   : > { %p209_p4 = scmp.eq.s32.totalorder %s1591_s12, 7  ;;  %p214_p5 = scmp.ne.s32.totalorder %s2481_s25, %s2477_s24 }
  0x15   : > { %p2634_p3 = por %p2625_p1, %p57_p0  ;;  %p215_p6 = scmp.eq.s32.totalorder %s1592_s13, 7 }
  0x16   : > { %p2640_p7 = por %p209_p4, %p208_p2  ;;  %p1593_p8 = scmp.ge.s32.totalorder %s2517_s11, 1 }
  0x17   : > { %p2645_p9 = por %p215_p6, %p214_p5  ;;  %p222_p10 = scmp.lt.s32.totalorder %s2517_s11, 9 }
  0x18   : > { %s3362_s17 = scalar_select %p2640_p7, 1, 0 }
  0x19   : > { %s3364_s18 = scalar_select %p2645_p9, 1, 0 }
  0x1a   : > { %3363 = sst [smem:[#allocation19_spill]] %s3362_s17  ;;  %p2650_p11 = pnand %p1593_p8, %p222_p10 }
  0x1b   : > { %3365 = sst [smem:[#allocation20_spill]] %s3364_s18  ;;  %s2519_s20 = smov [#allocation6]  }
  0x1c   : > { %s234_s21 = sshll.u32 %s2519_s20, 4  ;;  %p2001_p12 = pneg %p2650_p11  ;;  %s235_s21 = int_to_ptr.vmem [resolvable:$true] %s234_s21 }
  0x1d   : > { %s2520_s23 = smov [#allocation8]   ;;  %s2521_s12 = smov [#allocation9]  }
  0x1e   : > { %p2658_p13 = pnand %p2001_p12, %p2625_p1  ;;  %s250_s27 = sshll.u32 %s2520_s23, 4  ;;  %s251_s27 = int_to_ptr.vmem [resolvable:$true] %s250_s27 }
  0x1f   : > { %s266_s13 = sshll.u32 %s2521_s12, 4  ;;  %s2294_s15 = scalar_lea.vmem %s235_s21, 2048  ;;  %s267_s13 = int_to_ptr.vmem [resolvable:$true] %s266_s13 }
  0x20   : > { %p2285_p0 = pneg %p2658_p13  ;;  %p2295_p2 = scmp.ne.s32.totalorder %s235_s21, %s2294_s15 }
  0x21   : > { %p2302_p6 = scmp.lt.s32.totalorder %s235_s21, %s235_s21  ;;  %p2303_p8 = scmp.lt.s32.totalorder %s2294_s15, %s2294_s15 }
  0x22   : > { %p2297_p4 = pnand %p2295_p2, %p2285_p0 }
  0x23   : > { %p2304_p10 = por %p2303_p8, %p2302_p6 }
  0x24   : > { %p2298_p5 = pneg %p2297_p4 }
  0x26   : > { %p2305_p12 = pnand %p2304_p10, %p2298_p5 }
  0x28   : > { %2308 = shalt.err (!%p2305_p12)
}
  0x29   : > { %s3345_s20 = smov 128   ;;  %s3346_s23 = smov 8  }
  0x2a   : > { %s3368_s1 = sld [smem:[#allocation23_spill]]  ;;  %s2320_s24 = scalar_lea.vmem %s251_s27, 256 }
  0x2b   : > { %p2321_p2 = scmp.ne.s32.totalorder %s251_s27, %s2320_s24  ;;  %p2328_p5 = scmp.lt.s32.totalorder %s251_s27, %s251_s27 }
  0x2c   : > { %p2329_p8 = scmp.lt.s32.totalorder %s2320_s24, %s2320_s24 }
  0x2d   : > { %p2323_p4 = pnand %p2321_p2, %p2285_p0 }
  0x2e   : > { %p2330_p10 = por %p2329_p8, %p2328_p5 }
  0x2f   : > { %p2324_p6 = pneg %p2323_p4 }
  0x30   : > { %2004 = dma.hbm_to_vmem [thread:$0]  (!%p2658_p13), %s3368_s1, 2048, %s235_s21, [#allocation7], %s3345_s20, %s3345_s20, %s3346_s23  }
  0x31   : > { %p2331_p12 = pnand %p2330_p10, %p2324_p6 }
  0x33   : > { %2334 = shalt.err (!%p2331_p12)
}
  0x34   : > { %s3369_s3 = sld [smem:[#allocation24_spill]]  ;;  %s2346_s18 = scalar_lea.vmem %s267_s13, 2048 }
  0x35   : > { %p2347_p9 = scmp.ne.s32.totalorder %s267_s13, %s2346_s18  ;;  %p2354_p5 = scmp.lt.s32.totalorder %s267_s13, %s267_s13 }
  0x36   : > { %p2355_p6 = scmp.lt.s32.totalorder %s2346_s18, %s2346_s18 }
  0x37   : > { %p2349_p2 = pnand %p2347_p9, %p2285_p0 }
  0x38   : > { %p2356_p8 = por %p2355_p6, %p2354_p5 }
  0x39   : > { %p2350_p4 = pneg %p2349_p2 }
  0x3a   : > { %2007 = dma.hbm_to_vmem [thread:$0]  (!%p2658_p13), %s3369_s3, 256, %s251_s27, [#allocation7], %s3345_s20, %s3345_s20, %s3346_s23  }
  0x3b   : > { %p2357_p10 = pnand %p2356_p8, %p2350_p4 }
  0x3d   : > { %2360 = shalt.err (!%p2357_p10)
}
  0x3e   : > { %s3370_s5 = sld [smem:[#allocation25_spill]]  ;;  %s34_s21 = sadd.s32 1, %s2509_s9 }
  0x3f   : > { %p35_p9 = scmp.ge.s32.totalorder %s34_s21, 4  ;;  %s37_s22 = sadd.s32 1, %s2513_s10 }
  0x40   : > { %s44_s27 = sadd.s32 1, %s2497_s29  ;;  %p51_p0 = scmp.ne.s32.totalorder %s2497_s29, %s2493_s28 }
  0x41   : > { %s3397_s21 = smov (%p35_p9, %s34_s21), 0  ;;  %s3399_s22 = smov (!%p35_p9, %s37_s22), %s2513_s10 }
  0x42   : > { %3371 = sst [smem:[#allocation21_spill]] %s3397_s21  ;;  %p52_p12 = scmp.eq.s32.totalorder %s2517_s11, 0 }
  0x43   : > { %s194_s12 = ssub.s32 %s2509_s9, %s3397_s21  ;;  %p39_p2 = scmp.ge.s32.totalorder %s3399_s22, 2 }
  0x44   : > { %2010 = dma.hbm_to_vmem [thread:$0]  (!%p2658_p13), %s3370_s5, 2048, %s267_s13, [#allocation10], %s3345_s20, %s3345_s20, %s3346_s23  }
  0x45   : > { %p2022_p4 = scmp.lt.s32.totalorder %s2517_s11, 8  ;;  %p2709_p13 = por %p52_p12, %p51_p0 }
  0x46   : > { %s283_s15 = sand.u32 1, %s2497_s29   ;;  %s3401_s22 = smov (%p39_p2, %s3399_s22), 0 }
  0x47   : > { %3373 = sst [smem:[#allocation22_spill]] %s3401_s22  ;;  %s1598_s18 = sshll.u32 %s283_s15, 8 }
  0x48   : > { %s41_s7 = ssub.s32 %s2513_s10, %s3401_s22  ;;  %s1722_s20 = sshll.u32 %s2513_s10, 12 }
  0x49   : > { %p42_p5 = scmp.eq.s32.totalorder %s41_s7, 0  ;;  %s195_s24 = sor.u32 %s194_s12, %s41_s7 }
  0x4a   : > { %p196_p6 = scmp.eq.s32.totalorder %s195_s24, 0  ;;  %s3374_s1 = sadd.s32 1, %s2485_s26 }
  0x4b   : > { %s2720_s23 = scalar_select %p42_p5, %s2497_s29, %s44_s27  }
  0x4c   : > { %s2725_s3 = scalar_select %p196_p6, %s2485_s26, %s3374_s1  }
  0x4d   : > { %s293_s9 = scalar_lea.hbm %s3334_s0, %s1722_s20  ;;  %s287_s17 = scalar_lea.vmem [#allocation3], %s1598_s18 }
  0x4e   : > { %s294_s8 = sshll.u32 %s287_s17, 4  ;;  %p2734_p8 = pnand %p2022_p4, %p2709_p13  ;;  %s295_s8 = int_to_ptr.vmem [resolvable:$true] %s294_s8 }
  0x4f   : > { %s284_s12 = scalar_lea.sflag [#allocation4], %s283_s15  ;;  %s2374_s27 = scalar_lea.vmem %s295_s8, 4096 }
  0x50   : > { %p2363_p10 = pneg %p2734_p8  ;;  %p2375_p9 = scmp.ne.s32.totalorder %s295_s8, %s2374_s27 }
  0x51   : > { %s2524_s1 = smov [#allocation3]  }
  0x52   : > { %p2377_p0 = pnand %p2375_p9, %p2363_p10  ;;  %s2379_s5 = sshll.u32 %s2524_s1, 4  ;;  %s2380_s5 = int_to_ptr.vmem [resolvable:$false] %s2379_s5 }
  0x53   : > { %s2381_s20 = scalar_lea.vmem %s2380_s5, 8192  ;;  %p2382_p2 = scmp.lt.s32.totalorder %s295_s8, %s2380_s5 }
  0x54   : > { %p2378_p12 = pneg %p2377_p0  ;;  %p2383_p5 = scmp.lt.s32.totalorder %s2381_s20, %s2374_s27 }
  0x56   : > { %p2384_p6 = por %p2383_p5, %p2382_p2 }
  0x58   : > { %p2385_p7 = pnand %p2384_p6, %p2378_p12 }
  0x5a   : > { %2388 = shalt.err (!%p2385_p7)
}
  0x5b   : > { %s3376_s17 = smov 8   ;;  %s3377_s21 = smov 128  }
  0x5c   : > { %2014 = dma.hbm_to_vmem [thread:$0]  (!%p2734_p8), %s293_s9, 4096, %s295_s8, %s284_s12, %s3377_s21, %s3377_s21, %s3376_s17  }
  0x5d   : > { %306 = sbr.rel (%p2650_p11) target bundleno = 728 (0x2d8), region = 48  ;;  %s308_s13 = sand.u32 (!%p2650_p11), 1, %s2493_s28  }
  0x5e   : > { %s1602_s15 = sshll.u32 (!%p2650_p11), %s308_s13, 8  ;;  %s309_s18 = scalar_lea.sflag (!%p2650_p11), [#allocation4], %s308_s13 }
  0x5f   : > { %s2748_s7 = scalar_lea.vmem (!%p2650_p11), [#allocation3], %s1602_s15 }
  0x62   : > { %2460 = dma.done.wait (%p2634_p3), %s309_s18, 4096  }
  0x63   : > { %2462 = vsyncadd (%p2634_p3), %s309_s18, 4294963200 }
  0x64   : > { %2464 = dma.done.wait (%p2625_p1), [#allocation7], 2304  }
  0x65   : > { %2466 = vsyncadd (%p2625_p1), [#allocation7], 4294964992 }
  0x66   : > { %2468 = dma.done.wait (%p2625_p1), [#allocation10], 2048  }
  0x67   : > { %2470 = vsyncadd (%p2625_p1), [#allocation10], 4294965248  ;;  %s352_s8 = sand.u32 1, %s2481_s25   ;;  %p1607_p3 = scmp.ne.s32.totalorder %s2501_s30, 0 }
  0x68   : > { %s1606_s9 = sshll.u32 %s352_s8, 6 }
  0x69   : > { %s2765_s19 = scalar_lea.vmem [#allocation11], %s1606_s9  ;;  %359 = sbr.rel (%p1607_p3) target bundleno = 421 (0x1a5), region = 68 }
  0x6e   : > { %v461_v0 = vld [vmem:[#allocation6 + $0x78] sm:$0xff]  ;;  %v2768_v1 = vld [vmem:[#allocation6 + $0x70] sm:$0xff]  ;;  %v2525_v2 = vmov 0.0   ;;  %v459_v3 = vld [vmem:[#allocation6 + $0x68] sm:$0xff] }
  0x6f   : > { %1797 = vmatprep.subr.mxu0 %v461_v0  ;;  %1921 = vmatprep.subr.mxu1 %v461_v0  ;;  %360 = vst [vmem:[#allocation2] sm:$0xff] %v2525_v2  ;;  %361 = vst [vmem:[#allocation2 + $0x8] sm:$0xff] %v2525_v2  ;;  %v458_v4 = vld [vmem:[#allocation6 + $0x60] sm:$0xff]  ;;  %v457_v5 = vld [vmem:[#allocation6 + $0x58] sm:$0xff] }
  0x70   : > { %362 = vst [vmem:[#allocation2 + $0x10] sm:$0x3] %v2525_v2  ;;  %364 = vst [vmem:[#allocation2 + $0x20] sm:$0xff] %v2525_v2  ;;  %1798 = vmatpush3.msra.mxu0 %v461_v0  ;;  %1937 = vmatpush3.msra.mxu1 %v461_v0  ;;  %v456_v6 = vld [vmem:[#allocation6 + $0x50] sm:$0xff]  ;;  %v455_v7 = vld [vmem:[#allocation6 + $0x48] sm:$0xff] }
  0x71   : > { %365 = vst [vmem:[#allocation2 + $0x28] sm:$0x3] %v2525_v2  ;;  %411 = vst [vmem:[#allocation2 + $0x198] sm:$0xff] %v2525_v2  ;;  %1799 = vmatprep.subr.mxu0 %v2768_v1  ;;  %1922 = vmatprep.subr.mxu1 %v2768_v1  ;;  %v454_v8 = vld [vmem:[#allocation6 + $0x40] sm:$0xff]  ;;  %v453_v9 = vld [vmem:[#allocation6 + $0x38] sm:$0xff] }
  0x72   : > { %412 = vst [vmem:[#allocation2 + $0x1a0] sm:$0xff] %v2525_v2  ;;  %413 = vst [vmem:[#allocation2 + $0x1a8] sm:$0x3] %v2525_v2  ;;  %1800 = vmatpush3.msra.mxu0 %v2768_v1  ;;  %1938 = vmatpush3.msra.mxu1 %v2768_v1  ;;  %v452_v10 = vld [vmem:[#allocation6 + $0x30] sm:$0xff]  ;;  %v451_v11 = vld [vmem:[#allocation6 + $0x28] sm:$0xff] }
  0x73   : > { %363 = vst [vmem:[#allocation2 + $0x18] sm:$0xff] %v2525_v2  ;;  %366 = vst [vmem:[#allocation2 + $0x30] sm:$0xff] %v2525_v2  ;;  %1801 = vmatprep.subr.mxu0 %v459_v3  ;;  %1923 = vmatprep.subr.mxu1 %v459_v3  ;;  %v450_v12 = vld [vmem:[#allocation6 + $0x20] sm:$0xff]  ;;  %v449_v13 = vld [vmem:[#allocation6 + $0x18] sm:$0xff] }
  0x74   : > { %367 = vst [vmem:[#allocation2 + $0x38] sm:$0xff] %v2525_v2  ;;  %368 = vst [vmem:[#allocation2 + $0x40] sm:$0x3] %v2525_v2  ;;  %1802 = vmatpush3.msra.mxu0 %v459_v3  ;;  %1939 = vmatpush3.msra.mxu1 %v459_v3  ;;  %v448_v14 = vld [vmem:[#allocation6 + $0x10] sm:$0xff]  ;;  %v447_v15 = vld [vmem:[#allocation6 + $0x8] sm:$0xff] }
  0x75   : > { %369 = vst [vmem:[#allocation2 + $0x48] sm:$0xff] %v2525_v2  ;;  %370 = vst [vmem:[#allocation2 + $0x50] sm:$0xff] %v2525_v2  ;;  %1803 = vmatprep.subr.mxu0 %v458_v4  ;;  %1924 = vmatprep.subr.mxu1 %v458_v4  ;;  %v446_v16 = vld [vmem:[#allocation6] sm:$0xff]  ;;  %v415_v19 = vld [vmem:[%s2748_s7 + $0x8] sm:$0xff] }
  0x76   : > { %371 = vst [vmem:[#allocation2 + $0x58] sm:$0x3] %v2525_v2  ;;  %372 = vst [vmem:[#allocation2 + $0x60] sm:$0xff] %v2525_v2  ;;  %1804 = vmatpush3.msra.mxu0 %v458_v4  ;;  %1940 = vmatpush3.msra.mxu1 %v458_v4  ;;  %v414_v17 = vld [vmem:[%s2748_s7] sm:$0xff]  ;;  %v431_v20 = vld [vmem:[%s2748_s7 + $0x88] sm:$0xff] }
  0x77   : > { %373 = vst [vmem:[#allocation2 + $0x68] sm:$0xff] %v2525_v2  ;;  %374 = vst [vmem:[#allocation2 + $0x70] sm:$0x3] %v2525_v2  ;;  %1805 = vmatprep.subr.mxu0 %v457_v5  ;;  %1925 = vmatprep.subr.mxu1 %v457_v5  ;;  %v430_v18 = vld [vmem:[%s2748_s7 + $0x80] sm:$0xff]  ;;  %v416_v21 = vld [vmem:[%s2748_s7 + $0x10] sm:$0xff] }
  0x78   : > { %375 = vst [vmem:[#allocation2 + $0x78] sm:$0xff] %v2525_v2  ;;  %376 = vst [vmem:[#allocation2 + $0x80] sm:$0xff] %v2525_v2  ;;  %1806 = vmatpush3.msra.mxu0 %v457_v5  ;;  %1941 = vmatpush3.msra.mxu1 %v457_v5  ;;  %v432_v22 = vld [vmem:[%s2748_s7 + $0x90] sm:$0xff]  ;;  %v417_v23 = vld [vmem:[%s2748_s7 + $0x18] sm:$0xff] }
  0x79   : > { %377 = vst [vmem:[#allocation2 + $0x88] sm:$0x3] %v2525_v2  ;;  %378 = vst [vmem:[#allocation2 + $0x90] sm:$0xff] %v2525_v2  ;;  %1807 = vmatprep.subr.mxu0 %v456_v6  ;;  %1926 = vmatprep.subr.mxu1 %v456_v6  ;;  %v433_v24 = vld [vmem:[%s2748_s7 + $0x98] sm:$0xff]  ;;  %v418_v25 = vld [vmem:[%s2748_s7 + $0x20] sm:$0xff] }
  0x7a   : > { %379 = vst [vmem:[#allocation2 + $0x98] sm:$0xff] %v2525_v2  ;;  %380 = vst [vmem:[#allocation2 + $0xa0] sm:$0x3] %v2525_v2  ;;  %1808 = vmatpush3.msra.mxu0 %v456_v6  ;;  %1942 = vmatpush3.msra.mxu1 %v456_v6  ;;  %v434_v26 = vld [vmem:[%s2748_s7 + $0xa0] sm:$0xff]  ;;  %v419_v27 = vld [vmem:[%s2748_s7 + $0x28] sm:$0xff] }
  0x7b   : > { %381 = vst [vmem:[#allocation2 + $0xa8] sm:$0xff] %v2525_v2  ;;  %382 = vst [vmem:[#allocation2 + $0xb0] sm:$0xff] %v2525_v2  ;;  %1809 = vmatprep.subr.mxu0 %v455_v7  ;;  %1927 = vmatprep.subr.mxu1 %v455_v7  ;;  %v435_v28 = vld [vmem:[%s2748_s7 + $0xa8] sm:$0xff]  ;;  %v420_v29 = vld [vmem:[%s2748_s7 + $0x30] sm:$0xff] }
  0x7c   : > { %383 = vst [vmem:[#allocation2 + $0xb8] sm:$0x3] %v2525_v2  ;;  %384 = vst [vmem:[#allocation2 + $0xc0] sm:$0xff] %v2525_v2  ;;  %1810 = vmatpush3.msra.mxu0 %v455_v7  ;;  %1943 = vmatpush3.msra.mxu1 %v455_v7  ;;  %v436_v30 = vld [vmem:[%s2748_s7 + $0xb0] sm:$0xff]  ;;  %v421_v31 = vld [vmem:[%s2748_s7 + $0x38] sm:$0xff] }
  0x7d   : > { %385 = vst [vmem:[#allocation2 + $0xc8] sm:$0xff] %v2525_v2  ;;  %386 = vst [vmem:[#allocation2 + $0xd0] sm:$0x3] %v2525_v2  ;;  %1811 = vmatprep.subr.mxu0 %v454_v8  ;;  %1928 = vmatprep.subr.mxu1 %v454_v8  ;;  %v437_v32 = vld [vmem:[%s2748_s7 + $0xb8] sm:$0xff]  ;;  %v422_v33 = vld [vmem:[%s2748_s7 + $0x40] sm:$0xff] }
  0x7e   : > { %387 = vst [vmem:[#allocation2 + $0xd8] sm:$0xff] %v2525_v2  ;;  %388 = vst [vmem:[#allocation2 + $0xe0] sm:$0xff] %v2525_v2  ;;  %1812 = vmatpush3.msra.mxu0 %v454_v8  ;;  %1944 = vmatpush3.msra.mxu1 %v454_v8  ;;  %v438_v34 = vld [vmem:[%s2748_s7 + $0xc0] sm:$0xff]  ;;  %v423_v35 = vld [vmem:[%s2748_s7 + $0x48] sm:$0xff] }
  0x7f   : > { %389 = vst [vmem:[#allocation2 + $0xe8] sm:$0x3] %v2525_v2  ;;  %390 = vst [vmem:[#allocation2 + $0xf0] sm:$0xff] %v2525_v2  ;;  %1813 = vmatprep.subr.mxu0 %v453_v9  ;;  %1929 = vmatprep.subr.mxu1 %v453_v9  ;;  %v439_v36 = vld [vmem:[%s2748_s7 + $0xc8] sm:$0xff]  ;;  %v424_v37 = vld [vmem:[%s2748_s7 + $0x50] sm:$0xff] }
  0x80   : > { %391 = vst [vmem:[#allocation2 + $0xf8] sm:$0xff] %v2525_v2  ;;  %392 = vst [vmem:[#allocation2 + $0x100] sm:$0x3] %v2525_v2  ;;  %1814 = vmatpush3.msra.mxu0 %v453_v9  ;;  %1945 = vmatpush3.msra.mxu1 %v453_v9  ;;  %v440_v38 = vld [vmem:[%s2748_s7 + $0xd0] sm:$0xff]  ;;  %v425_v39 = vld [vmem:[%s2748_s7 + $0x58] sm:$0xff] }
  0x81   : > { %393 = vst [vmem:[#allocation2 + $0x108] sm:$0xff] %v2525_v2  ;;  %394 = vst [vmem:[#allocation2 + $0x110] sm:$0xff] %v2525_v2  ;;  %1815 = vmatprep.subr.mxu0 %v452_v10  ;;  %1930 = vmatprep.subr.mxu1 %v452_v10  ;;  %v441_v40 = vld [vmem:[%s2748_s7 + $0xd8] sm:$0xff]  ;;  %v426_v41 = vld [vmem:[%s2748_s7 + $0x60] sm:$0xff] }
  0x82   : > { %395 = vst [vmem:[#allocation2 + $0x118] sm:$0x3] %v2525_v2  ;;  %396 = vst [vmem:[#allocation2 + $0x120] sm:$0xff] %v2525_v2  ;;  %1816 = vmatpush3.msra.mxu0 %v452_v10  ;;  %1946 = vmatpush3.msra.mxu1 %v452_v10  ;;  %v442_v42 = vld [vmem:[%s2748_s7 + $0xe0] sm:$0xff]  ;;  %v427_v43 = vld [vmem:[%s2748_s7 + $0x68] sm:$0xff] }
  0x83   : > { %397 = vst [vmem:[#allocation2 + $0x128] sm:$0xff] %v2525_v2  ;;  %398 = vst [vmem:[#allocation2 + $0x130] sm:$0x3] %v2525_v2  ;;  %1817 = vmatprep.subr.mxu0 %v451_v11  ;;  %1931 = vmatprep.subr.mxu1 %v451_v11  ;;  %v443_v44 = vld [vmem:[%s2748_s7 + $0xe8] sm:$0xff]  ;;  %v428_v45 = vld [vmem:[%s2748_s7 + $0x70] sm:$0xff] }
  0x84   : > { %399 = vst [vmem:[#allocation2 + $0x138] sm:$0xff] %v2525_v2  ;;  %400 = vst [vmem:[#allocation2 + $0x140] sm:$0xff] %v2525_v2  ;;  %1818 = vmatpush3.msra.mxu0 %v451_v11  ;;  %1947 = vmatpush3.msra.mxu1 %v451_v11  ;;  %v444_v46 = vld [vmem:[%s2748_s7 + $0xf0] sm:$0xff]  ;;  %v429_v47 = vld [vmem:[%s2748_s7 + $0x78] sm:$0xff] }
  0x85   : > { %401 = vst [vmem:[#allocation2 + $0x148] sm:$0x3] %v2525_v2  ;;  %402 = vst [vmem:[#allocation2 + $0x150] sm:$0xff] %v2525_v2  ;;  %1819 = vmatprep.subr.mxu0 %v450_v12  ;;  %1932 = vmatprep.subr.mxu1 %v450_v12  ;;  %v445_v48 = vld [vmem:[%s2748_s7 + $0xf8] sm:$0xff]  ;;  %v2809_v49 = vld [vmem:[%s3336_s2] ss:$0 sm:$0xff] }
  0x86   : > { %403 = vst [vmem:[#allocation2 + $0x158] sm:$0xff] %v2525_v2  ;;  %404 = vst [vmem:[#allocation2 + $0x160] sm:$0x3] %v2525_v2  ;;  %1820 = vmatpush3.msra.mxu0 %v450_v12  ;;  %1948 = vmatpush3.msra.mxu1 %v450_v12 }
  0x87   : > { %405 = vst [vmem:[#allocation2 + $0x168] sm:$0xff] %v2525_v2  ;;  %406 = vst [vmem:[#allocation2 + $0x170] sm:$0xff] %v2525_v2  ;;  %1821 = vmatprep.subr.mxu0 %v449_v13  ;;  %1933 = vmatprep.subr.mxu1 %v449_v13 }
  0x88   : > { %407 = vst [vmem:[#allocation2 + $0x178] sm:$0x3] %v2525_v2  ;;  %408 = vst [vmem:[#allocation2 + $0x180] sm:$0xff] %v2525_v2  ;;  %1822 = vmatpush3.msra.mxu0 %v449_v13  ;;  %1949 = vmatpush3.msra.mxu1 %v449_v13 }
  0x89   : > { %409 = vst [vmem:[#allocation2 + $0x188] sm:$0xff] %v2525_v2  ;;  %410 = vst [vmem:[#allocation2 + $0x190] sm:$0x3] %v2525_v2  ;;  %1823 = vmatprep.subr.mxu0 %v448_v14  ;;  %1934 = vmatprep.subr.mxu1 %v448_v14 }
  0x8a   : > { %1824 = vmatpush3.msra.mxu0 %v448_v14  ;;  %1950 = vmatpush3.msra.mxu1 %v448_v14 }
  0x8b   : > { %1825 = vmatprep.subr.mxu0 %v447_v15  ;;  %1935 = vmatprep.subr.mxu1 %v447_v15 }
  0x8c   : > { %1826 = vmatpush3.msra.mxu0 %v447_v15  ;;  %1951 = vmatpush3.msra.mxu1 %v447_v15 }
  0x8d   : > { %1827 = vmatprep.subr.mxu0 %v446_v16  ;;  %1936 = vmatprep.subr.mxu1 %v446_v16 }
  0x8e   : > { %1828 = vmatpush3.msra.mxu0 %v446_v16  ;;  %1952 = vmatpush3.msra.mxu1 %v446_v16 }
  0x8f   : > { %1829 = vmatprep.mubr.f32.mxu0 %v414_v17  ;;  %1853 = vmatprep.mubr.f32.mxu1 %v430_v18 }
  0x90   : > { %1830 = vmatmul.mubr.f32.vlgmr.msra.gmra.mxu0 %v415_v19  ;;  %1854 = vmatmul.mubr.f32.vlgmr.msra.gmra.mxu1 %v431_v20 }
  0x91   : > { %1832 = vmatprep.mubr.f32.mxu0 %v416_v21  ;;  %1856 = vmatprep.mubr.f32.mxu1 %v432_v22 }
  0x94   : > { %1833 = vmatmul.mubr.f32.gmra.mxu0 %v417_v23  ;;  %1857 = vmatmul.mubr.f32.gmra.mxu1 %v433_v24 }
  0x95   : > { %1835 = vmatprep.mubr.f32.mxu0 %v418_v25  ;;  %1859 = vmatprep.mubr.f32.mxu1 %v434_v26 }
  0x98   : > { %1836 = vmatmul.mubr.f32.gmra.mxu0 %v419_v27  ;;  %1860 = vmatmul.mubr.f32.gmra.mxu1 %v435_v28 }
  0x99   : > { %1838 = vmatprep.mubr.f32.mxu0 %v420_v29  ;;  %1862 = vmatprep.mubr.f32.mxu1 %v436_v30 }
  0x9c   : > { %1839 = vmatmul.mubr.f32.gmra.mxu0 %v421_v31  ;;  %1863 = vmatmul.mubr.f32.gmra.mxu1 %v437_v32 }
  0x9d   : > { %1841 = vmatprep.mubr.f32.mxu0 %v422_v33  ;;  %1865 = vmatprep.mubr.f32.mxu1 %v438_v34 }
  0xa0   : > { %1842 = vmatmul.mubr.f32.gmra.mxu0 %v423_v35  ;;  %1866 = vmatmul.mubr.f32.gmra.mxu1 %v439_v36 }
  0xa1   : > { %1844 = vmatprep.mubr.f32.mxu0 %v424_v37  ;;  %1868 = vmatprep.mubr.f32.mxu1 %v440_v38 }
  0xa4   : > { %1845 = vmatmul.mubr.f32.gmra.mxu0 %v425_v39  ;;  %1869 = vmatmul.mubr.f32.gmra.mxu1 %v441_v40 }
  0xa5   : > { %1847 = vmatprep.mubr.f32.mxu0 %v426_v41  ;;  %1871 = vmatprep.mubr.f32.mxu1 %v442_v42 }
  0xa8   : > { %1848 = vmatmul.mubr.f32.gmra.mxu0 %v427_v43  ;;  %1872 = vmatmul.mubr.f32.gmra.mxu1 %v443_v44 }
  0xa9   : > { %1850 = vmatprep.mubr.f32.mxu0 %v428_v45  ;;  %1874 = vmatprep.mubr.f32.mxu1 %v444_v46 }
  0xac   : > { %1851 = vmatmul.mubr.f32.gmra.mxu0 %v429_v47  ;;  %1875 = vmatmul.mubr.f32.gmra.mxu1 %v445_v48 }
 0x150   : > { %v1831_v50 = vpop.f32.mrf.mxu0  ;;  %v1855_v51 = vpop.f32.mrf.mxu1 }
 0x151   : > { %v2812_v52 = vadd.f32 %v1831_v50, %v2809_v49  ;;  %v2815_v53 = vadd.f32 %v1855_v51, %v2809_v49 }
 0x152   : > { %v535_v54 = vpop.f32.mrf.mxu0  ;;  %v615_v55 = vpop.f32.mrf.mxu1 }
 0x153   : > { %v1610_v56 = vmul.f32 -1.442695, %v2812_v52  ;;  %v1626_v57 = vmul.f32 -1.442695, %v2815_v53  ;;  %v2820_v58 = vadd.f32 %v2809_v49, %v535_v54  ;;  %v2823_v59 = vadd.f32 %v2809_v49, %v615_v55 }
 0x154   : > { %v1834_v60 = vpop.f32.mrf.mxu0  ;;  %v1858_v61 = vpop.f32.mrf.mxu1 }
 0x155   : > { %2123 = vpow2.f32 %v1610_v56  ;;  %v1609_v62 = vmul.f32 -1.442695, %v2820_v58  ;;  %v1625_v63 = vmul.f32 -1.442695, %v2823_v59  ;;  %v2828_v0 = vadd.f32 %v1834_v60, %v2809_v49 }
 0x156   : > { %2125 = vpow2.f32 %v1626_v57  ;;  %v2831_v1 = vadd.f32 %v1858_v61, %v2809_v49  ;;  %v545_v2 = vpop.f32.mrf.mxu0  ;;  %v625_v3 = vpop.f32.mrf.mxu1 }
 0x157   : > { %2127 = vpow2.f32 %v1609_v62  ;;  %v1612_v4 = vmul.f32 -1.442695, %v2828_v0  ;;  %v2835_v5 = vadd.f32 %v2809_v49, %v545_v2  ;;  %v2838_v6 = vadd.f32 %v2809_v49, %v625_v3 }
 0x158   : > { %2129 = vpow2.f32 %v1625_v63  ;;  %v1628_v7 = vmul.f32 -1.442695, %v2831_v1  ;;  %v1837_v8 = vpop.f32.mrf.mxu0  ;;  %v1861_v9 = vpop.f32.mrf.mxu1 }
 0x159   : > { %2131 = vpow2.f32 %v1612_v4  ;;  %v1611_v10 = vmul.f32 -1.442695, %v2835_v5  ;;  %v1627_v11 = vmul.f32 -1.442695, %v2838_v6  ;;  %v2844_v12 = vadd.f32 %v1837_v8, %v2809_v49 }
 0x15a   : > { %2133 = vpow2.f32 %v1628_v7  ;;  %v2847_v13 = vadd.f32 %v1861_v9, %v2809_v49  ;;  %v555_v14 = vpop.f32.mrf.mxu0  ;;  %v635_v15 = vpop.f32.mrf.mxu1 }
 0x15b   : > { %2135 = vpow2.f32 %v1611_v10  ;;  %v1614_v16 = vmul.f32 -1.442695, %v2844_v12  ;;  %v2851_v17 = vadd.f32 %v2809_v49, %v555_v14  ;;  %v2854_v18 = vadd.f32 %v2809_v49, %v635_v15 }
 0x15c   : > { %2137 = vpow2.f32 %v1627_v11  ;;  %v1630_v19 = vmul.f32 -1.442695, %v2847_v13  ;;  %v1840_v20 = vpop.f32.mrf.mxu0  ;;  %v1864_v21 = vpop.f32.mrf.mxu1 }
 0x15d   : > { %2139 = vpow2.f32 %v1614_v16  ;;  %v1613_v22 = vmul.f32 -1.442695, %v2851_v17  ;;  %v1629_v23 = vmul.f32 -1.442695, %v2854_v18  ;;  %v2860_v24 = vadd.f32 %v1840_v20, %v2809_v49 }
 0x15e   : > { %2141 = vpow2.f32 %v1630_v19  ;;  %v2863_v25 = vadd.f32 %v1864_v21, %v2809_v49  ;;  %v565_v26 = vpop.f32.mrf.mxu0  ;;  %v645_v27 = vpop.f32.mrf.mxu1 }
 0x15f   : > { %2143 = vpow2.f32 %v1613_v22  ;;  %v1616_v28 = vmul.f32 -1.442695, %v2860_v24  ;;  %v2867_v29 = vadd.f32 %v2809_v49, %v565_v26  ;;  %v2870_v30 = vadd.f32 %v2809_v49, %v645_v27 }
 0x160   : > { %2145 = vpow2.f32 %v1629_v23  ;;  %v1632_v31 = vmul.f32 -1.442695, %v2863_v25  ;;  %v1843_v32 = vpop.f32.mrf.mxu0  ;;  %v1867_v33 = vpop.f32.mrf.mxu1 }
 0x161   : > { %2147 = vpow2.f32 %v1616_v28  ;;  %v1615_v34 = vmul.f32 -1.442695, %v2867_v29  ;;  %v1631_v35 = vmul.f32 -1.442695, %v2870_v30  ;;  %v2876_v11 = vadd.f32 %v1843_v32, %v2809_v49 }
 0x162   : > { %v2124_v36 = vpop.eup %2123  ;;  %2149 = vpow2.f32 %v1632_v31  ;;  %v575_v37 = vpop.f32.mrf.mxu0  ;;  %v2879_v19 = vadd.f32 %v1867_v33, %v2809_v49 }
 0x163   : > { %v655_v38 = vpop.f32.mrf.mxu1  ;;  %v2126_v39 = vpop.eup %2125  ;;  %v791_v40 = vadd.f32 1.0, %v2124_v36  ;;  %2151 = vpow2.f32 %v1615_v34  ;;  %v2882_v22 = vadd.f32 %v2809_v49, %v575_v37  ;;  %v1618_v34 = vmul.f32 -1.442695, %v2876_v11 }
 0x164   : > { %v2128_v41 = vpop.eup %2127  ;;  %v807_v42 = vadd.f32 1.0, %v2126_v39  ;;  %2153 = vpow2.f32 %v1631_v35  ;;  %v1846_v43 = vpop.f32.mrf.mxu0  ;;  %v2885_v27 = vadd.f32 %v2809_v49, %v655_v38  ;;  %v1634_v39 = vmul.f32 -1.442695, %v2879_v19 }
 0x165   : > { %v2130_v44 = vpop.eup %2129  ;;  %2155 = vrcp.f32 %v791_v40  ;;  %v790_v45 = vadd.f32 1.0, %v2128_v41  ;;  %v1870_v46 = vpop.f32.mrf.mxu1  ;;  %v2889_v33 = vadd.f32 %v1846_v43, %v2809_v49 }
 0x166   : > { %v2132_v47 = vpop.eup %2131  ;;  %2157 = vrcp.f32 %v807_v42  ;;  %v806_v48 = vadd.f32 1.0, %v2130_v44  ;;  %v585_v56 = vpop.f32.mrf.mxu0  ;;  %v2893_v40 = vadd.f32 %v1870_v46, %v2809_v49  ;;  %v1617_v42 = vmul.f32 -1.442695, %v2882_v22 }
 0x167   : > { %v2134_v50 = vpop.eup %2133  ;;  %2159 = vrcp.f32 %v790_v45  ;;  %v793_v51 = vadd.f32 1.0, %v2132_v47  ;;  %v665_v61 = vpop.f32.mrf.mxu1  ;;  %v2898_v44 = vadd.f32 %v2809_v49, %v585_v56  ;;  %v1633_v47 = vmul.f32 -1.442695, %v2885_v27 }
 0x168   : > { %v2136_v54 = vpop.eup %2135  ;;  %2161 = vrcp.f32 %v806_v48  ;;  %v809_v55 = vadd.f32 1.0, %v2134_v50  ;;  %v1849_v8 = vpop.f32.mrf.mxu0  ;;  %v2903_v48 = vadd.f32 %v2809_v49, %v665_v61 }
 0x169   : > { %v2138_v57 = vpop.eup %2137  ;;  %2163 = vrcp.f32 %v793_v51  ;;  %v792_v60 = vadd.f32 1.0, %v2136_v54  ;;  %v1873_v14 = vpop.f32.mrf.mxu1  ;;  %v1620_v51 = vmul.f32 -1.442695, %v2889_v33  ;;  %v2908_v54 = vadd.f32 %v1849_v8, %v2809_v49 }
 0x16a   : > { %v2140_v62 = vpop.eup %2139  ;;  %2165 = vrcp.f32 %v809_v55  ;;  %v808_v63 = vadd.f32 1.0, %v2138_v57  ;;  %v595_v28 = vpop.f32.mrf.mxu0  ;;  %v1636_v57 = vmul.f32 -1.442695, %v2893_v40 }
 0x16b   : > { %v2142_v2 = vpop.eup %2141  ;;  %2167 = vrcp.f32 %v792_v60  ;;  %v795_v3 = vadd.f32 1.0, %v2140_v62  ;;  %v675_v35 = vpop.f32.mrf.mxu1  ;;  %v2913_v60 = vadd.f32 %v1873_v14, %v2809_v49  ;;  %v1619_v62 = vmul.f32 -1.442695, %v2898_v44 }
 0x16c   : > { %v2144_v4 = vpop.eup %2143  ;;  %2169 = vrcp.f32 %v808_v63  ;;  %v811_v7 = vadd.f32 1.0, %v2142_v2  ;;  %v1852_v46 = vpop.f32.mrf.mxu0  ;;  %v2918_v63 = vadd.f32 %v2809_v49, %v595_v28 }
 0x16d   : > { %v2146_v9 = vpop.eup %2145  ;;  %2171 = vrcp.f32 %v795_v3  ;;  %v794_v10 = vadd.f32 1.0, %v2144_v4  ;;  %v1876_v55 = vpop.f32.mrf.mxu1  ;;  %v1635_v3 = vmul.f32 -1.442695, %v2903_v48  ;;  %v2923_v4 = vadd.f32 %v2809_v49, %v675_v35 }
 0x16e   : > { %v2148_v15 = vpop.eup %2147  ;;  %2173 = vrcp.f32 %v811_v7  ;;  %v810_v16 = vadd.f32 1.0, %v2146_v9  ;;  %v605_v7 = vpop.f32.mrf.mxu0  ;;  %v1622_v9 = vmul.f32 -1.442695, %v2908_v54 }
 0x16f   : > { %v2150_v20 = vpop.eup %2149  ;;  %2175 = vrcp.f32 %v794_v10  ;;  %v797_v21 = vadd.f32 1.0, %v2148_v15  ;;  %v2928_v10 = vadd.f32 %v1852_v46, %v2809_v49  ;;  %v685_v14 = vpop.f32.mrf.mxu1 }
 0x170   : > { %v2152_v23 = vpop.eup %2151  ;;  %2177 = vrcp.f32 %v810_v16  ;;  %v813_v26 = vadd.f32 1.0, %v2150_v20  ;;  %v1638_v16 = vmul.f32 -1.442695, %v2913_v60  ;;  %v2933_v20 = vadd.f32 %v1876_v55, %v2809_v49 }
 0x171   : > { %v2154_v31 = vpop.eup %2153  ;;  %2179 = vrcp.f32 %v797_v21  ;;  %v796_v32 = vadd.f32 1.0, %v2152_v23  ;;  %v1621_v23 = vmul.f32 -1.442695, %v2918_v63  ;;  %v1624_v35 = vmul.f32 -1.442695, %v2928_v10 }
 0x172   : > { %v2156_v36 = vpop.eup %2155  ;;  %2181 = vrcp.f32 %v813_v26  ;;  %v812_v37 = vadd.f32 1.0, %v2154_v31  ;;  %v2938_v26 = vadd.f32 %v2809_v49, %v605_v7  ;;  %v1637_v31 = vmul.f32 -1.442695, %v2923_v4 }
 0x173   : > { %v2158_v38 = vpop.eup %2157  ;;  %v887_v41 = vmul.f32 %v2156_v36, %v2812_v52  ;;  %2183 = vrcp.f32 %v796_v32  ;;  %v2943_v32 = vadd.f32 %v2809_v49, %v685_v14 }
 0x174   : > { %v2160_v43 = vpop.eup %2159  ;;  %v903_v45 = vmul.f32 %v2158_v38, %v2815_v53  ;;  %2185 = vrcp.f32 %v812_v37  ;;  %v1623_v49 = vmul.f32 -1.442695, %v2938_v26 }
 0x175   : > { %v2162_v50 = vpop.eup %2161  ;;  %920 = vst [vmem:[#allocation2 + $0x21] sm:$0xff] %v887_v41  ;;  %v886_v52 = vmul.f32 %v2160_v43, %v2820_v58  ;;  %2187 = vpow2.f32 %v1618_v34 }
 0x176   : > { %v2164_v56 = vpop.eup %2163  ;;  %936 = vst [vmem:[#allocation2 + $0xe1] sm:$0xff] %v903_v45  ;;  %v902_v53 = vmul.f32 %v2162_v50, %v2823_v59  ;;  %2189 = vpow2.f32 %v1634_v39 }
 0x177   : > { %v2166_v61 = vpop.eup %2165  ;;  %919 = vst [vmem:[#allocation2 + $0x19] sm:$0xff] %v886_v52  ;;  %v889_v58 = vmul.f32 %v2164_v56, %v2828_v0  ;;  %2191 = vpow2.f32 %v1617_v42  ;;  %v1639_v42 = vmul.f32 -1.442695, %v2943_v32 }
 0x178   : > { %v2168_v2 = vpop.eup %2167  ;;  %935 = vst [vmem:[#allocation2 + $0xd9] sm:$0xff] %v902_v53  ;;  %v905_v59 = vmul.f32 %v2166_v61, %v2831_v1  ;;  %2193 = vpow2.f32 %v1633_v47 }
 0x179   : > { %v2170_v8 = vpop.eup %2169  ;;  %922 = vst [vmem:[#allocation2 + $0x39] sm:$0xff] %v889_v58  ;;  %v888_v0 = vmul.f32 %v2168_v2, %v2835_v5  ;;  %2195 = vpow2.f32 %v1620_v51 }
 0x17a   : > { %v2172_v15 = vpop.eup %2171  ;;  %938 = vst [vmem:[#allocation2 + $0xf9] sm:$0xff] %v905_v59  ;;  %v904_v1 = vmul.f32 %v2170_v8, %v2838_v6  ;;  %2197 = vpow2.f32 %v1636_v57 }
 0x17b   : > { %v2174_v21 = vpop.eup %2173  ;;  %921 = vst [vmem:[#allocation2 + $0x31] sm:$0xff] %v888_v0  ;;  %v891_v5 = vmul.f32 %v2172_v15, %v2844_v12  ;;  %2199 = vpow2.f32 %v1619_v62 }
 0x17c   : > { %v2176_v28 = vpop.eup %2175  ;;  %937 = vst [vmem:[#allocation2 + $0xf1] sm:$0xff] %v904_v1  ;;  %v907_v6 = vmul.f32 %v2174_v21, %v2847_v13  ;;  %2201 = vpow2.f32 %v1635_v3  ;;  %v1640_v13 = vmul.f32 -1.442695, %v2933_v20 }
 0x17d   : > { %v2178_v34 = vpop.eup %2177  ;;  %924 = vst [vmem:[#allocation2 + $0x51] sm:$0xff] %v891_v5  ;;  %v890_v12 = vmul.f32 %v2176_v28, %v2851_v17  ;;  %2203 = vpow2.f32 %v1622_v9 }
 0x17e   : > { %v2180_v36 = vpop.eup %2179  ;;  %940 = vst [vmem:[#allocation2 + $0x111] sm:$0xff] %v907_v6  ;;  %v906_v37 = vmul.f32 %v2178_v34, %v2854_v18  ;;  %2205 = vpow2.f32 %v1638_v16 }
 0x17f   : > { %v2182_v39 = vpop.eup %2181  ;;  %923 = vst [vmem:[#allocation2 + $0x49] sm:$0xff] %v890_v12  ;;  %v893_v38 = vmul.f32 %v2180_v36, %v2860_v24  ;;  %2207 = vpow2.f32 %v1621_v23 }
 0x180   : > { %v2184_v41 = vpop.eup %2183  ;;  %939 = vst [vmem:[#allocation2 + $0x109] sm:$0xff] %v906_v37  ;;  %v909_v17 = vmul.f32 %v2182_v39, %v2863_v25  ;;  %2209 = vpow2.f32 %v1637_v31 }
 0x181   : > { %v2186_v43 = vpop.eup %2185  ;;  %926 = vst [vmem:[#allocation2 + $0x69] sm:$0xff] %v893_v38  ;;  %v892_v18 = vmul.f32 %v2184_v41, %v2867_v29  ;;  %2211 = vpow2.f32 %v1624_v35 }
 0x182   : > { %v2188_v45 = vpop.eup %2187  ;;  %942 = vst [vmem:[#allocation2 + $0x129] sm:$0xff] %v909_v17  ;;  %v908_v47 = vmul.f32 %v2186_v43, %v2870_v30  ;;  %2213 = vpow2.f32 %v1640_v13 }
 0x183   : > { %v2190_v24 = vpop.eup %2189  ;;  %925 = vst [vmem:[#allocation2 + $0x61] sm:$0xff] %v892_v18  ;;  %v799_v46 = vadd.f32 1.0, %v2188_v45  ;;  %2215 = vpow2.f32 %v1623_v49 }
 0x184   : > { %v2192_v50 = vpop.eup %2191  ;;  %941 = vst [vmem:[#allocation2 + $0x121] sm:$0xff] %v908_v47  ;;  %v815_v25 = vadd.f32 1.0, %v2190_v24  ;;  %2217 = vpow2.f32 %v1639_v42 }
 0x185   : > { %v2194_v52 = vpop.eup %2193  ;;  %2219 = vrcp.f32 %v799_v46  ;;  %v798_v51 = vadd.f32 1.0, %v2192_v50 }
 0x186   : > { %v2196_v55 = vpop.eup %2195  ;;  %2221 = vrcp.f32 %v815_v25  ;;  %v814_v29 = vadd.f32 1.0, %v2194_v52 }
 0x187   : > { %v2198_v56 = vpop.eup %2197  ;;  %2223 = vrcp.f32 %v798_v51  ;;  %v801_v53 = vadd.f32 1.0, %v2196_v55 }
 0x188   : > { %v2200_v57 = vpop.eup %2199  ;;  %2225 = vrcp.f32 %v814_v29  ;;  %v817_v30 = vadd.f32 1.0, %v2198_v56 }
 0x189   : > { %v2202_v61 = vpop.eup %2201  ;;  %2227 = vrcp.f32 %v801_v53  ;;  %v800_v58 = vadd.f32 1.0, %v2200_v57 }
 0x18a   : > { %v2204_v62 = vpop.eup %2203  ;;  %2229 = vrcp.f32 %v817_v30  ;;  %v816_v2 = vadd.f32 1.0, %v2202_v61 }
 0x18b   : > { %v2206_v59 = vpop.eup %2205  ;;  %2231 = vrcp.f32 %v800_v58  ;;  %v803_v3 = vadd.f32 1.0, %v2204_v62 }
 0x18c   : > { %v2208_v7 = vpop.eup %2207  ;;  %2233 = vrcp.f32 %v816_v2  ;;  %v819_v8 = vadd.f32 1.0, %v2206_v59 }
 0x18d   : > { %v2210_v0 = vpop.eup %2209  ;;  %2235 = vrcp.f32 %v803_v3  ;;  %v802_v9 = vadd.f32 1.0, %v2208_v7 }
 0x18e   : > { %v2212_v14 = vpop.eup %2211  ;;  %2237 = vrcp.f32 %v819_v8  ;;  %v818_v15 = vadd.f32 1.0, %v2210_v0 }
 0x18f   : > { %v2214_v1 = vpop.eup %2213  ;;  %2239 = vrcp.f32 %v802_v9  ;;  %v805_v16 = vadd.f32 1.0, %v2212_v14 }
 0x190   : > { %v2216_v21 = vpop.eup %2215  ;;  %2241 = vrcp.f32 %v818_v15  ;;  %v821_v5 = vadd.f32 1.0, %v2214_v1 }
 0x191   : > { %v2218_v23 = vpop.eup %2217  ;;  %2243 = vrcp.f32 %v805_v16  ;;  %v804_v28 = vadd.f32 1.0, %v2216_v21 }
 0x192   : > { %v2220_v6 = vpop.eup %2219  ;;  %2245 = vrcp.f32 %v821_v5  ;;  %v820_v31 = vadd.f32 1.0, %v2218_v23 }
 0x193   : > { %v2222_v34 = vpop.eup %2221  ;;  %v895_v12 = vmul.f32 %v2220_v6, %v2876_v11  ;;  %2247 = vrcp.f32 %v804_v28 }
 0x194   : > { %v2224_v35 = vpop.eup %2223  ;;  %v911_v36 = vmul.f32 %v2222_v34, %v2879_v19  ;;  %2249 = vrcp.f32 %v820_v31 }
 0x195   : > { %v2226_v37 = vpop.eup %2225  ;;  %928 = vst [vmem:[#allocation2 + $0x81] sm:$0xff] %v895_v12  ;;  %v894_v13 = vmul.f32 %v2224_v35, %v2882_v22 }
 0x196   : > { %v2228_v39 = vpop.eup %2227  ;;  %944 = vst [vmem:[#allocation2 + $0x141] sm:$0xff] %v911_v36  ;;  %v910_v38 = vmul.f32 %v2226_v37, %v2885_v27 }
 0x197   : > { %v2230_v49 = vpop.eup %2229  ;;  %927 = vst [vmem:[#allocation2 + $0x79] sm:$0xff] %v894_v13  ;;  %v897_v41 = vmul.f32 %v2228_v39, %v2889_v33 }
 0x198   : > { %v2232_v17 = vpop.eup %2231  ;;  %943 = vst [vmem:[#allocation2 + $0x139] sm:$0xff] %v910_v38  ;;  %v913_v11 = vmul.f32 %v2230_v49, %v2893_v40 }
 0x199   : > { %v2234_v42 = vpop.eup %2233  ;;  %930 = vst [vmem:[#allocation2 + $0x99] sm:$0xff] %v897_v41  ;;  %v896_v19 = vmul.f32 %v2232_v17, %v2898_v44 }
 0x19a   : > { %v2236_v43 = vpop.eup %2235  ;;  %946 = vst [vmem:[#allocation2 + $0x159] sm:$0xff] %v913_v11  ;;  %v912_v22 = vmul.f32 %v2234_v42, %v2903_v48 }
 0x19b   : > { %v2238_v18 = vpop.eup %2237  ;;  %929 = vst [vmem:[#allocation2 + $0x91] sm:$0xff] %v896_v19  ;;  %v899_v27 = vmul.f32 %v2236_v43, %v2908_v54 }
 0x19c   : > { %v2240_v45 = vpop.eup %2239  ;;  %945 = vst [vmem:[#allocation2 + $0x151] sm:$0xff] %v912_v22  ;;  %v915_v33 = vmul.f32 %v2238_v18, %v2913_v60 }
 0x19d   : > { %v2242_v47 = vpop.eup %2241  ;;  %932 = vst [vmem:[#allocation2 + $0xb1] sm:$0xff] %v899_v27  ;;  %v898_v40 = vmul.f32 %v2240_v45, %v2918_v63 }
 0x19e   : > { %v2244_v24 = vpop.eup %2243  ;;  %948 = vst [vmem:[#allocation2 + $0x171] sm:$0xff] %v915_v33  ;;  %v914_v44 = vmul.f32 %v2242_v47, %v2923_v4 }
 0x19f   : > { %v2246_v46 = vpop.eup %2245  ;;  %931 = vst [vmem:[#allocation2 + $0xa9] sm:$0xff] %v898_v40  ;;  %v901_v48 = vmul.f32 %v2244_v24, %v2928_v10 }
 0x1a0   : > { %v2248_v50 = vpop.eup %2247  ;;  %947 = vst [vmem:[#allocation2 + $0x169] sm:$0xff] %v914_v44  ;;  %v917_v54 = vmul.f32 %v2246_v46, %v2933_v20 }
 0x1a1   : > { %v2250_v25 = vpop.eup %2249  ;;  %934 = vst [vmem:[#allocation2 + $0xc9] sm:$0xff] %v901_v48  ;;  %v900_v60 = vmul.f32 %v2248_v50, %v2938_v26 }
 0x1a2   : > { %950 = vst [vmem:[#allocation2 + $0x189] sm:$0xff] %v917_v54  ;;  %v916_v52 = vmul.f32 %v2250_v25, %v2943_v32 }
 0x1a3   : > { %933 = vst [vmem:[#allocation2 + $0xc1] sm:$0xff] %v900_v60 }
 0x1a4   : > { %949 = vst [vmem:[#allocation2 + $0x181] sm:$0xff] %v916_v52 }
 0x1a5 PF: > { %v1307_v63 = vld [vmem:[#allocation9 + $0x78] sm:$0xff]  ;;  %v1306_v4 = vld [vmem:[#allocation9 + $0x70] sm:$0xff]  ;;  %s1642_s22 = smul.u32 96, %s2501_s30  ;;  %v1305_v10 = vld [vmem:[#allocation9 + $0x68] sm:$0xff]  ;;  %s1723_s1 = sshll.u32 %s2501_s30, 6 }
 0x1a6   : > { %1877 = vmatprep.subr.mxu0 %v1307_v63  ;;  %1953 = vmatprep.subr.mxu1 %v1307_v63  ;;  %v1304_v20 = vld [vmem:[#allocation9 + $0x60] sm:$0xff]  ;;  %v1303_v26 = vld [vmem:[#allocation9 + $0x58] sm:$0xff]  ;;  %v2975_v51 = vld [vmem:[#allocation8] ss:$0 sm:$0xff]  ;;  %s3241_s5 = scalar_lea.vmem %s2748_s7, %s1723_s1 [#allocation3]  ;;  %s3378_s21 = sld [smem:[#allocation17_spill]] }
 0x1a7   : > { %1878 = vmatpush3.msra.mxu0 %v1307_v63  ;;  %1969 = vmatpush3.msra.mxu1 %v1307_v63  ;;  %s2972_s24 = scalar_lea.vmem [#allocation2], %s1642_s22  ;;  %v1302_v55 = vld [vmem:[#allocation9 + $0x50] sm:$0xff]  ;;  %v1301_v2 = vld [vmem:[#allocation9 + $0x48] sm:$0xff]  ;;  %v3017_v34 = vld [vmem:[#allocation8 + $0x8] ss:$0 sm:$0xff]  ;;  %s1724_s13 = sshll.u32 %s2501_s30, 3 }
 0x1a8   : > { %1879 = vmatprep.subr.mxu0 %v1306_v4  ;;  %1954 = vmatprep.subr.mxu1 %v1306_v4  ;;  %v2979_v53 = vld [vmem:[#allocation8 + $0x1] ss:$0 sm:$0xff]  ;;  %v2983_v61 = vld [vmem:[#allocation8 + $0x2] ss:$0 sm:$0xff]  ;;  %v2986_v62 = vld [vmem:[#allocation8 + $0x3] ss:$0 sm:$0xff] }
 0x1a9   : > { %1880 = vmatpush3.msra.mxu0 %v1306_v4  ;;  %1970 = vmatpush3.msra.mxu1 %v1306_v4  ;;  %v2990_v7 = vld [vmem:[#allocation8 + $0x4] ss:$0 sm:$0xff]  ;;  %v2993_v9 = vld [vmem:[#allocation8 + $0x5] ss:$0 sm:$0xff]  ;;  %v2998_v15 = vld [vmem:[#allocation8 + $0x6] ss:$0 sm:$0xff] }
 0x1aa   : > { %1881 = vmatprep.subr.mxu0 %v1305_v10  ;;  %1955 = vmatprep.subr.mxu1 %v1305_v10  ;;  %v3015_v31 = vld [vmem:[#allocation8 + $0x7] ss:$0 sm:$0xff]  ;;  %v1300_v37 = vld [vmem:[#allocation9 + $0x40] sm:$0xff]  ;;  %v1299_v49 = vld [vmem:[#allocation9 + $0x38] sm:$0xff]  ;;  %s3379_s30 = sld [smem:[#allocation19_spill]]  ;;  %s1463_s9 = sshll.u32 %s2765_s19, 4  ;;  %s3268_s9 = int_to_ptr.vmem [resolvable:$true] %s1463_s9 }
 0x1ab   : > { %v954_v32 = vld [vmem:[%s2972_s24] sm:$0xff]  ;;  %1882 = vmatpush3.msra.mxu0 %v1305_v10  ;;  %1971 = vmatpush3.msra.mxu1 %v1305_v10  ;;  %v1648_v58 = vld [vmem:[%s2972_s24 + $0x18] sm:$0xff]  ;;  %v2996_v14 = vld [vmem:[%s2972_s24 + $0x30] sm:$0xff]  ;;  %s3380_s22 = sld [smem:[#allocation26_spill]]  ;;  %s3274_s12 = scalar_lea.sflag [#allocation5], %s352_s8 }
 0x1ac   : > { %v967_v29 = vmul.f32 %v2975_v51, %v954_v32  ;;  %v983_v56 = vld [vmem:[%s2972_s24 + $0x1] sm:$0xff]  ;;  %1883 = vmatprep.subr.mxu0 %v1304_v20  ;;  %1956 = vmatprep.subr.mxu1 %v1304_v20  ;;  %v1657_v3 = vld [vmem:[%s2972_s24 + $0x19] sm:$0xff]  ;;  %v1057_v0 = vmul.f32 %v2986_v62, %v1648_v58  ;;  %v3005_v21 = vld [vmem:[%s2972_s24 + $0x31] sm:$0xff]  ;;  %v971_v23 = vmul.f32 %v2996_v14, %v2975_v51  ;;  %s1718_s15 = sshll.u32 %s3378_s21, 5  ;;  %s2389_s27 = scalar_lea.vmem %s3268_s9, 1024 }
 0x1ad   : > { %v1012_v57 = vld [vmem:[%s2972_s24 + $0x2] sm:$0xff]  ;;  %v996_v30 = vmul.f32 %v2979_v53, %v983_v56  ;;  %1884 = vmatpush3.msra.mxu0 %v1304_v20  ;;  %1972 = vmatpush3.msra.mxu1 %v1304_v20  ;;  %v1086_v1 = vmul.f32 %v2990_v7, %v1657_v3  ;;  %v3002_v16 = vld [vmem:[%s2972_s24 + $0x1a] sm:$0xff]  ;;  %v3008_v5 = vld [vmem:[%s2972_s24 + $0x32] sm:$0xff]  ;;  %v3013_v28 = vmul.f32 %v1648_v58, %v2975_v51  ;;  %s1460_s18 = sadd.s32 %s1724_s13, %s1718_s15  ;;  %p2390_p1 = scmp.ne.s32.totalorder %s3268_s9, %s2389_s27 }
 0x1ae   : > { %v1025_v59 = vmul.f32 %v2983_v61, %v1012_v57  ;;  %1885 = vmatprep.subr.mxu0 %v1303_v26  ;;  %1957 = vmatprep.subr.mxu1 %v1303_v26  ;;  %v1000_v12 = vmul.f32 %v3005_v21, %v2979_v53  ;;  %v3022_v35 = vld [vmem:[%s2972_s24 + $0x48] sm:$0xff]  ;;  %v3025_v36 = vmul.f32 %v1657_v3, %v2979_v53  ;;  %v3053_v44 = vld [vmem:[%s2972_s24 + $0x20] sm:$0xff]  ;;  %v1298_v46 = vld [vmem:[#allocation9 + $0x30] sm:$0xff]  ;;  %s1719_s7 = sshll.u32 %s1460_s18, 7  ;;  %s2526_s1 = smov [#allocation11]  }
 0x1af   : > { %v1004_v8 = vadd.f32 %v996_v30, %v967_v29  ;;  %1886 = vmatpush3.msra.mxu0 %v1303_v26  ;;  %1973 = vmatpush3.msra.mxu1 %v1303_v26  ;;  %v1115_v13 = vmul.f32 %v2993_v9, %v3002_v16  ;;  %v1147_v39 = vmul.f32 %v2998_v15, %v2996_v14  ;;  %v3036_v42 = vld [vmem:[%s2972_s24 + $0x49] sm:$0xff]  ;;  %v3056_v48 = vld [vmem:[%s2972_s24 + $0x60] sm:$0xff]  ;;  %v3077_v56 = vld [vmem:[%s2972_s24 + $0x38] sm:$0xff] }
 0x1b0   : > { %1887 = vmatprep.subr.mxu0 %v1302_v55  ;;  %1958 = vmatprep.subr.mxu1 %v1302_v55  ;;  %v1029_v38 = vmul.f32 %v3008_v5, %v2983_v61  ;;  %v1008_v17 = vadd.f32 %v1000_v12, %v971_v23  ;;  %v1061_v11 = vmul.f32 %v2986_v62, %v3022_v35  ;;  %v955_v19 = vld [vmem:[%s2972_s24 + $0x8] sm:$0xff]  ;;  %v3088_v3 = vld [vmem:[%s2972_s24 + $0x3a] sm:$0xff]  ;;  %p3381_p7 = scmp.ne.s32.totalorder %s3379_s30, 0 }
 0x1b1   : > { %v1033_v6 = vadd.f32 %v1025_v59, %v1004_v8  ;;  %1888 = vmatpush3.msra.mxu0 %v1302_v55  ;;  %1974 = vmatpush3.msra.mxu1 %v1302_v55  ;;  %v1176_v43 = vmul.f32 %v3015_v31, %v3005_v21  ;;  %v1205_v22 = vmul.f32 %v3017_v34, %v3008_v5  ;;  %v3046_v27 = vld [vmem:[%s2972_s24 + $0x4a] sm:$0xff]  ;;  %v3064_v10 = vld [vmem:[%s2972_s24 + $0x61] sm:$0xff]  ;;  %v3085_v59 = vld [vmem:[%s2972_s24 + $0x39] sm:$0xff] }
 0x1b2   : > { %1889 = vmatprep.subr.mxu0 %v1301_v2  ;;  %1959 = vmatprep.subr.mxu1 %v1301_v2  ;;  %v1090_v18 = vmul.f32 %v2990_v7, %v3036_v42  ;;  %v984_v45 = vld [vmem:[%s2972_s24 + $0x9] sm:$0xff]  ;;  %v1037_v40 = vadd.f32 %v1029_v38, %v1008_v17  ;;  %v1119_v24 = vmul.f32 %v2993_v9, %v3046_v27  ;;  %v3074_v29 = vld [vmem:[%s2972_s24 + $0x21] sm:$0xff]  ;;  %v3102_v38 = vld [vmem:[%s3338_s4] ss:$0 sm:$0xff]  ;;  %p2391_p11 = pnand %p2390_p1, %p3381_p7 }
 0x1b3   : > { %v1065_v41 = vadd.f32 %v1057_v0, %v1033_v6  ;;  %1890 = vmatpush3.msra.mxu0 %v1301_v2  ;;  %1975 = vmatpush3.msra.mxu1 %v1301_v2  ;;  %v1013_v33 = vld [vmem:[%s2972_s24 + $0xa] sm:$0xff]  ;;  %v968_v50 = vmul.f32 %v2975_v51, %v955_v19  ;;  %v997_v54 = vmul.f32 %v2979_v53, %v984_v45  ;;  %v3069_v26 = vld [vmem:[%s2972_s24 + $0x62] sm:$0xff] }
 0x1b4   : > { %1891 = vmatprep.subr.mxu0 %v1300_v37  ;;  %1960 = vmatprep.subr.mxu1 %v1300_v37  ;;  %v1026_v25 = vmul.f32 %v2983_v61, %v1013_v33  ;;  %v1297_v60 = vld [vmem:[#allocation9 + $0x28] sm:$0xff]  ;;  %v1069_v63 = vadd.f32 %v1061_v11, %v1037_v40  ;;  %v1151_v4 = vmul.f32 %v2998_v15, %v3056_v48  ;;  %v1296_v8 = vld [vmem:[#allocation9 + $0x20] sm:$0xff]  ;;  %p2392_p4 = pneg %p2391_p11 }
 0x1b5   : > { %v1094_v47 = vadd.f32 %v1086_v1, %v1065_v41  ;;  %1892 = vmatpush3.msra.mxu0 %v1300_v37  ;;  %1976 = vmatpush3.msra.mxu1 %v1300_v37  ;;  %v1180_v20 = vmul.f32 %v3015_v31, %v3064_v10  ;;  %v1005_v32 = vadd.f32 %v997_v54, %v968_v50  ;;  %v3082_v2 = vld [vmem:[%s2972_s24 + $0x22] sm:$0xff] }
 0x1b6   : > { %1893 = vmatprep.subr.mxu0 %v1299_v49  ;;  %1961 = vmatprep.subr.mxu1 %v1299_v49  ;;  %v1058_v55 = vmul.f32 %v2986_v62, %v3053_v44  ;;  %v1098_v30 = vadd.f32 %v1090_v18, %v1069_v63  ;;  %v1209_v58 = vmul.f32 %v3017_v34, %v3069_v26  ;;  %v1294_v18 = vld [vmem:[#allocation9 + $0x10] sm:$0xff]  ;;  %v1293_v50 = vld [vmem:[#allocation9 + $0x8] sm:$0xff] }
 0x1b7   : > { %v1123_v52 = vadd.f32 %v1115_v13, %v1094_v47  ;;  %1894 = vmatpush3.msra.mxu0 %v1299_v49  ;;  %1977 = vmatpush3.msra.mxu1 %v1299_v49  ;;  %v1034_v0 = vadd.f32 %v1026_v25, %v1005_v32  ;;  %v1087_v1 = vmul.f32 %v2990_v7, %v3074_v29  ;;  %v3097_v13 = vld [vmem:[%s2972_s24 + $0x50] sm:$0xff] }
 0x1b8   : > { %1895 = vmatprep.subr.mxu0 %v1298_v46  ;;  %1962 = vmatprep.subr.mxu1 %v1298_v46  ;;  %v1116_v23 = vmul.f32 %v2993_v9, %v3082_v2  ;;  %v1127_v12 = vadd.f32 %v1119_v24, %v1098_v30  ;;  %v972_v37 = vmul.f32 %v3077_v56, %v2975_v51 }
 0x1b9   : > { %v1155_v57 = vadd.f32 %v1147_v39, %v1123_v52  ;;  %1896 = vmatpush3.msra.mxu0 %v1298_v46  ;;  %1978 = vmatpush3.msra.mxu1 %v1298_v46  ;;  %v1295_v39 = vld [vmem:[#allocation9 + $0x18] sm:$0xff]  ;;  %v1066_v49 = vadd.f32 %v1058_v55, %v1034_v0  ;;  %v1001_v41 = vmul.f32 %v3085_v59, %v2979_v53  ;;  %v1292_v55 = vld [vmem:[#allocation9] sm:$0xff]  ;;  %v3136_v0 = vld [vmem:[%s2972_s24 + $0x68] sm:$0xff] }
 0x1ba   : > { %1897 = vmatprep.subr.mxu0 %v1297_v60  ;;  %1963 = vmatprep.subr.mxu1 %v1297_v60  ;;  %v1030_v17 = vmul.f32 %v3088_v3, %v2983_v61  ;;  %v1159_v19 = vadd.f32 %v1151_v4, %v1127_v12  ;;  %v1062_v47 = vmul.f32 %v2986_v62, %v3097_v13  ;;  %v3118_v46 = vld [vmem:[%s2972_s24 + $0x51] sm:$0xff] }
 0x1bb   : > { %v1184_v6 = vadd.f32 %v1176_v43, %v1155_v57  ;;  %1898 = vmatpush3.msra.mxu0 %v1297_v60  ;;  %1979 = vmatpush3.msra.mxu1 %v1297_v60  ;;  %v1148_v43 = vmul.f32 %v2998_v15, %v3077_v56  ;;  %v1095_v45 = vadd.f32 %v1087_v1, %v1066_v49  ;;  %v3123_v52 = vld [vmem:[%s2972_s24 + $0x52] sm:$0xff] }
 0x1bc   : > { %1899 = vmatprep.subr.mxu0 %v1296_v8  ;;  %1964 = vmatprep.subr.mxu1 %v1296_v8  ;;  %v1009_v33 = vadd.f32 %v1001_v41, %v972_v37  ;;  %v1188_v24 = vadd.f32 %v1180_v20, %v1159_v19  ;;  %v1091_v60 = vmul.f32 %v2990_v7, %v3118_v46 }
 0x1bd   : > { %v1213_v11 = vadd.f32 %v1205_v22, %v1184_v6  ;;  %1900 = vmatpush3.msra.mxu0 %v1296_v8  ;;  %1980 = vmatpush3.msra.mxu1 %v1296_v8  ;;  %v1177_v22 = vmul.f32 %v3015_v31, %v3085_v59  ;;  %v1124_v54 = vadd.f32 %v1116_v23, %v1095_v45 }
 0x1be   : > { %1901 = vmatprep.subr.mxu0 %v1295_v39  ;;  %1965 = vmatprep.subr.mxu1 %v1295_v39  ;;  %v1038_v25 = vadd.f32 %v1030_v17, %v1009_v33  ;;  %v1217_v4 = vadd.f32 %v1209_v58, %v1188_v24  ;;  %v1206_v20 = vmul.f32 %v3017_v34, %v3088_v3 }
 0x1bf   : > { %v3113_v40 = vadd.f32 %v3102_v38, %v1213_v11  ;;  %1902 = vmatpush3.msra.mxu0 %v1295_v39  ;;  %1981 = vmatpush3.msra.mxu1 %v1295_v39  ;;  %v1120_v32 = vmul.f32 %v2993_v9, %v3123_v52  ;;  %v1156_v57 = vadd.f32 %v1148_v43, %v1124_v54 }
 0x1c0   : > { %1903 = vmatprep.subr.mxu0 %v1294_v18  ;;  %1966 = vmatprep.subr.mxu1 %v1294_v18  ;;  %v1070_v30 = vadd.f32 %v1062_v47, %v1038_v25  ;;  %v1006_v8 = vadd.f32 %v3025_v36, %v3013_v28  ;;  %v3133_v58 = vadd.f32 %v3102_v38, %v1217_v4  ;;  %v3145_v36 = vld [vmem:[%s2972_s24 + $0x69] sm:$0xff] }
 0x1c1   : > { %v1705_v63 = vmul.f32 -1.442695, %v3113_v40  ;;  %1904 = vmatpush3.msra.mxu0 %v1294_v18  ;;  %1982 = vmatpush3.msra.mxu1 %v1294_v18  ;;  %v1027_v1 = vmul.f32 %v3002_v16, %v2983_v61  ;;  %v1059_v23 = vmul.f32 %v2996_v14, %v2986_v62  ;;  %v1185_v6 = vadd.f32 %v1177_v22, %v1156_v57  ;;  %v3151_v16 = vld [vmem:[%s2972_s24 + $0x6a] sm:$0xff]  ;;  %v1692_v57 = vld [vmem:[%s2972_s24 + $0x79] sm:$0xff] }
 0x1c2   : > { %1905 = vmatprep.subr.mxu0 %v1293_v50  ;;  %1967 = vmatprep.subr.mxu1 %v1293_v50  ;;  %v1099_v12 = vadd.f32 %v1091_v60, %v1070_v30  ;;  %v1152_v28 = vmul.f32 %v2998_v15, %v3136_v0  ;;  %v1709_v37 = vmul.f32 -1.442695, %v3133_v58  ;;  %v1181_v39 = vmul.f32 %v3015_v31, %v3145_v36 }
 0x1c3   : > { %2251 = vpow2.f32 %v1705_v63  ;;  %1906 = vmatpush3.msra.mxu0 %v1293_v50  ;;  %1983 = vmatpush3.msra.mxu1 %v1293_v50  ;;  %v1035_v49 = vadd.f32 %v1027_v1, %v1006_v8  ;;  %v1088_v14 = vmul.f32 %v3005_v21, %v2990_v7  ;;  %v1214_v41 = vadd.f32 %v1206_v20, %v1185_v6 }
 0x1c4   : > { %1907 = vmatprep.subr.mxu0 %v1292_v55  ;;  %1968 = vmatprep.subr.mxu1 %v1292_v55  ;;  %v1128_v17 = vadd.f32 %v1120_v32, %v1099_v12  ;;  %v1210_v11 = vmul.f32 %v3017_v34, %v3151_v16  ;;  %2253 = vpow2.f32 %v1709_v37  ;;  %v1117_v43 = vmul.f32 %v3008_v5, %v2993_v9 }
 0x1c5   : > { %1908 = vmatpush3.msra.mxu0 %v1292_v55  ;;  %1984 = vmatpush3.msra.mxu1 %v1292_v55  ;;  %v1067_v19 = vadd.f32 %v1059_v23, %v1035_v49  ;;  %v973_v18 = vmul.f32 %v3022_v35, %v2975_v51  ;;  %v3162_v45 = vadd.f32 %v3102_v38, %v1214_v41  ;;  %v1683_v55 = vld [vmem:[%s2972_s24 + $0x78] sm:$0xff] }
 0x1c6   : > { %v1160_v33 = vadd.f32 %v1152_v28, %v1128_v17  ;;  %v1002_v21 = vmul.f32 %v3036_v42, %v2979_v53  ;;  %v1031_v47 = vmul.f32 %v3046_v27, %v2983_v61  ;;  %v1149_v22 = vmul.f32 %v2998_v15, %v3022_v35  ;;  %v1701_v17 = vld [vmem:[%s2972_s24 + $0x7a] sm:$0xff] }
 0x1c7   : > { %v1096_v24 = vadd.f32 %v1088_v14, %v1067_v19  ;;  %v1706_v5 = vmul.f32 -1.442695, %v3162_v45  ;;  %v1063_v25 = vmul.f32 %v3056_v48, %v2986_v62  ;;  %v1178_v63 = vmul.f32 %v3015_v31, %v3036_v42 }
 0x1c8   : > { %v1189_v50 = vadd.f32 %v1181_v39, %v1160_v33  ;;  %v1010_v54 = vadd.f32 %v1002_v21, %v973_v18  ;;  %v1092_v4 = vmul.f32 %v3064_v10, %v2990_v7  ;;  %v970_v20 = vmul.f32 %v3053_v44, %v2975_v51 }
 0x1c9   : > { %v1125_v60 = vadd.f32 %v1117_v43, %v1096_v24  ;;  %2255 = vpow2.f32 %v1706_v5  ;;  %v999_v30 = vmul.f32 %v3074_v29, %v2979_v53  ;;  %v1207_v48 = vmul.f32 %v3017_v34, %v3046_v27 }
 0x1ca   : > { %v1218_v32 = vadd.f32 %v1210_v11, %v1189_v50  ;;  %v1039_v35 = vadd.f32 %v1031_v47, %v1010_v54  ;;  %v1121_v42 = vmul.f32 %v3069_v26, %v2993_v9  ;;  %v1028_v10 = vmul.f32 %v3082_v2, %v2983_v61 }
 0x1cb   : > { %v1157_v8 = vadd.f32 %v1149_v22, %v1125_v60  ;;  %v1007_v23 = vadd.f32 %v999_v30, %v970_v20  ;;  %v1060_v6 = vmul.f32 %v3077_v56, %v2986_v62  ;;  %v1153_v12 = vmul.f32 %v2998_v15, %v1683_v55  ;;  %v1702_v30 = vld [vmem:[%s2972_s24 + $0x82] sm:$0xff] }
 0x1cc   : > { %v3190_v44 = vadd.f32 %v3102_v38, %v1218_v32  ;;  %v1071_v1 = vadd.f32 %v1063_v25, %v1039_v35  ;;  %v1182_v27 = vmul.f32 %v3015_v31, %v1692_v57  ;;  %v1089_v26 = vmul.f32 %v3085_v59, %v2990_v7  ;;  %v1693_v32 = vld [vmem:[%s2972_s24 + $0x81] sm:$0xff] }
 0x1cd   : > { %v1186_v29 = vadd.f32 %v1178_v63, %v1157_v8  ;;  %v1036_v39 = vadd.f32 %v1028_v10, %v1007_v23  ;;  %v974_v49 = vmul.f32 %v3097_v13, %v2975_v51  ;;  %v1003_v56 = vmul.f32 %v3118_v46, %v2979_v53 }
 0x1ce   : > { %v1710_v2 = vmul.f32 -1.442695, %v3190_v44  ;;  %v1100_v37 = vadd.f32 %v1092_v4, %v1071_v1  ;;  %v1032_v11 = vmul.f32 %v3123_v52, %v2983_v61  ;;  %v1118_v43 = vmul.f32 %v3088_v3, %v2993_v9 }
 0x1cf   : > { %v1215_v41 = vadd.f32 %v1207_v48, %v1186_v29  ;;  %v1068_v59 = vadd.f32 %v1060_v6, %v1036_v39  ;;  %v1011_v51 = vadd.f32 %v1003_v56, %v974_v49  ;;  %v1064_v33 = vmul.f32 %v3136_v0, %v2986_v62  ;;  %v1684_v0 = vld [vmem:[%s2972_s24 + $0x80] sm:$0xff]  ;;  %s3266_s24 = scalar_lea.hbm %s3380_s22, %s1719_s7 }
 0x1d0   : > { %v2252_v28 = vpop.eup %2251  ;;  %2257 = vpow2.f32 %v1710_v2  ;;  %v1129_v19 = vadd.f32 %v1121_v42, %v1100_v37  ;;  %v1211_v47 = vmul.f32 %v3017_v34, %v1701_v17  ;;  %v1150_v24 = vmul.f32 %v2998_v15, %v3097_v13 }
 0x1d1   : > { %v1260_v14 = vadd.f32 1.0, %v2252_v28  ;;  %v3209_v18 = vadd.f32 %v3102_v38, %v1215_v41  ;;  %v2254_v21 = vpop.eup %2253  ;;  %v1097_v61 = vadd.f32 %v1089_v26, %v1068_v59  ;;  %v1040_v5 = vadd.f32 %v1032_v11, %v1011_v51 }
 0x1d2   : > { %v1161_v53 = vadd.f32 %v1153_v12, %v1129_v19  ;;  %v1264_v22 = vadd.f32 1.0, %v2254_v21  ;;  %v1093_v50 = vmul.f32 %v3145_v36, %v2990_v7  ;;  %v1179_v62 = vmul.f32 %v3015_v31, %v3118_v46 }
 0x1d3   : > { %2259 = vrcp.f32 %v1260_v14  ;;  %v1707_v3 = vmul.f32 -1.442695, %v3209_v18  ;;  %v1126_v25 = vadd.f32 %v1118_v43, %v1097_v61  ;;  %v1072_v60 = vadd.f32 %v1064_v33, %v1040_v5 }
 0x1d4   : > { %v1190_v54 = vadd.f32 %v1182_v27, %v1161_v53  ;;  %2261 = vrcp.f32 %v1264_v22  ;;  %v1122_v13 = vmul.f32 %v3151_v16, %v2993_v9  ;;  %v1208_v20 = vmul.f32 %v3017_v34, %v3123_v52  ;;  %v1422_v22 = vld [vmem:[%s3241_s5] sm:$0xff] }
 0x1d5   : > { %2263 = vpow2.f32 %v1707_v3  ;;  %v1158_v4 = vadd.f32 %v1150_v24, %v1126_v25  ;;  %v1101_v36 = vadd.f32 %v1093_v50, %v1072_v60  ;;  %v1154_v35 = vmul.f32 %v2998_v15, %v1684_v0  ;;  %v1427_v25 = vld [vmem:[%s3241_s5 + $0x28] sm:$0xff]  ;;  %v1426_v60 = vld [vmem:[%s3241_s5 + $0x20] sm:$0xff] }
 0x1d6   : > { %v1219_v63 = vadd.f32 %v1211_v47, %v1190_v54  ;;  %v2256_v7 = vpop.eup %2255  ;;  %v1183_v48 = vmul.f32 %v3015_v31, %v1693_v32  ;;  %v1212_v10 = vmul.f32 %v3017_v34, %v1702_v30  ;;  %v1423_v47 = vld [vmem:[%s3241_s5 + $0x8] sm:$0xff]  ;;  %v1425_v32 = vld [vmem:[%s3241_s5 + $0x18] sm:$0xff] }
 0x1d7   : > { %v1261_v55 = vadd.f32 1.0, %v2256_v7  ;;  %v1187_v57 = vadd.f32 %v1179_v62, %v1158_v4  ;;  %v1130_v8 = vadd.f32 %v1122_v13, %v1101_v36  ;;  %v1429_v30 = vld [vmem:[%s3241_s5 + $0x38] sm:$0xff] }
 0x1d8   : > { %v1234_v46 = vadd.f32 %v3102_v38, %v1219_v63 }
 0x1d9   : > { %2265 = vrcp.f32 %v1261_v55  ;;  %v1216_v16 = vadd.f32 %v1208_v20, %v1187_v57  ;;  %v1162_v42 = vadd.f32 %v1154_v35, %v1130_v8  ;;  %v1424_v35 = vld [vmem:[%s3241_s5 + $0x10] sm:$0xff] }
 0x1da   : > { %v1711_v9 = vmul.f32 -1.442695, %v1234_v46 }
 0x1db   : > { %v1231_v52 = vadd.f32 %v3102_v38, %v1216_v16  ;;  %v1191_v23 = vadd.f32 %v1183_v48, %v1162_v42  ;;  %v1428_v16 = vld [vmem:[%s3241_s5 + $0x30] sm:$0xff]  ;;  %s2393_s5 = sshll.u32 %s2526_s1, 4  ;;  %s2394_s5 = int_to_ptr.vmem [resolvable:$false] %s2393_s5 }
 0x1dc   : > { %2267 = vpow2.f32 %v1711_v9  ;;  %s2395_s20 = scalar_lea.vmem %s2394_s5, 2048  ;;  %p2396_p13 = scmp.lt.s32.totalorder %s3268_s9, %s2394_s5 }
 0x1dd   : > { %v2258_v1 = vpop.eup %2257  ;;  %v1708_v29 = vmul.f32 -1.442695, %v1231_v52  ;;  %v1220_v27 = vadd.f32 %v1212_v10, %v1191_v23  ;;  %p2397_p8 = scmp.lt.s32.totalorder %s2395_s20, %s2389_s27 }
 0x1de   : > { %v1265_v6 = vadd.f32 1.0, %v2258_v1 }
 0x1df   : > { %v1235_v31 = vadd.f32 %v3102_v38, %v1220_v27  ;;  %p2398_p10 = por %p2397_p8, %p2396_p13 }
 0x1e0   : > { %v2260_v15 = vpop.eup %2259  ;;  %2269 = vrcp.f32 %v1265_v6 }
 0x1e1   : > { %v1284_v12 = vmul.f32 %v2260_v15, %v3113_v40  ;;  %2271 = vpow2.f32 %v1708_v29  ;;  %v2262_v26 = vpop.eup %2261  ;;  %v1712_v2 = vmul.f32 -1.442695, %v1235_v31  ;;  %p2399_p9 = pnand %p2398_p10, %p2392_p4 }
 0x1e2   : > { %v2264_v28 = vpop.eup %2263  ;;  %v1288_v34 = vmul.f32 %v2262_v26, %v3133_v58 }
 0x1e3   : > { %1909 = vmatprep.mubr.f32.mxu0 %v1284_v12  ;;  %v1262_v37 = vadd.f32 1.0, %v2264_v28  ;;  %2273 = vpow2.f32 %v1712_v2 }
 0x1e4   : > { %1915 = vmatprep.mubr.f32.mxu1 %v1288_v34 }
 0x1e5   : > { %2275 = vrcp.f32 %v1262_v37 }
 0x1e6   : > { %v2266_v39 = vpop.eup %2265 }
 0x1e7   : > { %v1285_v49 = vmul.f32 %v2266_v39, %v3162_v45 }
 0x1e9   : > { %v2268_v14 = vpop.eup %2267  ;;  %1910 = vmatmul.mubr.f32.vlgmr.msra.gmra.mxu0 %v1285_v49 }
 0x1ea   : > { %v1266_v40 = vadd.f32 1.0, %v2268_v14 }
 0x1ec   : > { %2277 = vrcp.f32 %v1266_v40 }
 0x1ed   : > { %v2270_v41 = vpop.eup %2269 }
 0x1ee   : > { %v2272_v17 = vpop.eup %2271  ;;  %v1289_v38 = vmul.f32 %v2270_v41, %v3190_v44 }
 0x1ef   : > { %v1263_v56 = vadd.f32 1.0, %v2272_v17 }
 0x1f0   : > { %1916 = vmatmul.mubr.f32.vlgmr.msra.gmra.mxu1 %v1289_v38  ;;  %v2274_v58 = vpop.eup %2273 }
 0x1f1   : > { %2279 = vrcp.f32 %v1263_v56  ;;  %v1267_v19 = vadd.f32 1.0, %v2274_v58 }
 0x1f2   : > { %v2276_v11 = vpop.eup %2275 }
 0x1f3   : > { %v1286_v59 = vmul.f32 %v2276_v11, %v3209_v18  ;;  %2281 = vrcp.f32 %v1267_v19  ;;  %v1713_v18 = vld [vmem:[%s3340_s6] ss:$0 sm:$0xff] }
 0x1f5   : > { %1912 = vmatprep.mubr.f32.mxu0 %v1286_v59 }
 0x1f9   : > { %v2278_v45 = vpop.eup %2277 }
 0x1fa   : > { %v1290_v43 = vmul.f32 %v2278_v45, %v1234_v46 }
 0x1fc   : > { %1918 = vmatprep.mubr.f32.mxu1 %v1290_v43 }
 0x1fe   : > { %v2280_v51 = vpop.eup %2279 }
 0x1ff   : > { %v1287_v33 = vmul.f32 %v2280_v51, %v1231_v52 }
 0x200   : > { %v2282_v44 = vpop.eup %2281 }
 0x201   : > { %1913 = vmatmul.mubr.f32.gmra.mxu0 %v1287_v33  ;;  %v1291_v21 = vmul.f32 %v2282_v44, %v1235_v31 }
 0x203   : > { %1919 = vmatmul.mubr.f32.gmra.mxu1 %v1291_v21 }
 0x2a9   : > { %v1911_v53 = vpop.f32.mrf.mxu0 }
 0x2aa   : > { %v1387_v61 = vadd.f32 %v1911_v53, %v1713_v18 }
 0x2ab   : > { %v1381_v24 = vpop.f32.mrf.mxu0 }
 0x2ac   : > { %v1431_v3 = vadd.f32 %v1423_v47, %v1387_v61  ;;  %v1382_v5 = vadd.f32 %v1713_v18, %v1381_v24 }
 0x2ae   : > { %1439 = vst [vmem:[%s2765_s19 + $0x8] sm:$0xff] %v1431_v3  ;;  %v1430_v50 = vadd.f32 %v1422_v22, %v1382_v5 }
 0x2b0   : > { %v1917_v54 = vpop.f32.mrf.mxu1  ;;  %1438 = vst [vmem:[%s2765_s19] sm:$0xff] %v1430_v50 }
 0x2b1   : > { %v1407_v62 = vadd.f32 %v1917_v54, %v1713_v18 }
 0x2b2   : > { %v1401_v0 = vpop.f32.mrf.mxu1 }
 0x2b3   : > { %v1435_v13 = vadd.f32 %v1427_v25, %v1407_v62  ;;  %v1402_v63 = vadd.f32 %v1713_v18, %v1401_v0 }
 0x2b5   : > { %1443 = vst [vmem:[%s2765_s19 + $0x28] sm:$0xff] %v1435_v13  ;;  %v1434_v4 = vadd.f32 %v1426_v60, %v1402_v63 }
 0x2b7   : > { %1442 = vst [vmem:[%s2765_s19 + $0x20] sm:$0xff] %v1434_v4 }
 0x2c1   : > { %v1914_v20 = vpop.f32.mrf.mxu0 }
 0x2c2   : > { %v1397_v7 = vadd.f32 %v1914_v20, %v1713_v18 }
 0x2c3   : > { %v1391_v36 = vpop.f32.mrf.mxu0  ;;  %v1920_v57 = vpop.f32.mrf.mxu1 }
 0x2c4   : > { %v1433_v55 = vadd.f32 %v1425_v32, %v1397_v7  ;;  %v1392_v46 = vadd.f32 %v1713_v18, %v1391_v36  ;;  %v1417_v8 = vadd.f32 %v1920_v57, %v1713_v18 }
 0x2c5   : > { %v1411_v9 = vpop.f32.mrf.mxu1 }
 0x2c6   : > { %1441 = vst [vmem:[%s2765_s19 + $0x18] sm:$0xff] %v1433_v55  ;;  %v1432_v48 = vadd.f32 %v1424_v35, %v1392_v46  ;;  %v1437_v42 = vadd.f32 %v1429_v30, %v1417_v8  ;;  %v1412_v10 = vadd.f32 %v1713_v18, %v1411_v9 }
 0x2c8   : > { %1440 = vst [vmem:[%s2765_s19 + $0x10] sm:$0xff] %v1432_v48  ;;  %1445 = vst [vmem:[%s2765_s19 + $0x38] sm:$0xff] %v1437_v42  ;;  %v1436_v52 = vadd.f32 %v1428_v16, %v1412_v10 }
 0x2ca   : > { %1444 = vst [vmem:[%s2765_s19 + $0x30] sm:$0xff] %v1436_v52 }
 0x2cb   : > { %2402 = shalt.err (!%p2399_p9)
}
 0x2cc   : > { %s2403_s8 = scalar_lea.hbm %s3266_s24, 1024  ;;  %s2407_s21 = scalar_lea.hbm %s3380_s22, 8192 }
 0x2cd   : > { %p2404_p0 = scmp.ne.s32.totalorder %s3266_s24, %s2403_s8  ;;  %p2408_p5 = scmp.lt.s32.totalorder %s3266_s24, %s3380_s22 }
 0x2ce   : > { %p2409_p6 = scmp.lt.s32.totalorder %s2407_s21, %s2403_s8 }
 0x2cf   : > { %p2405_p12 = pnand %p2404_p0, %p3381_p7 }
 0x2d0   : > { %p2410_p3 = por %p2409_p6, %p2408_p5 }
 0x2d1   : > { %p2406_p2 = pneg %p2405_p12 }
 0x2d3   : > { %p2411_p1 = pnand %p2410_p3, %p2406_p2 }
 0x2d5   : > { %2414 = shalt.err (!%p2411_p1)
}
 0x2d6   : > { %s2527_s18 = smov 128   ;;  %s2528_s7 = smov 8  }
 0x2d7   : > { %1999 = dma.vmem_to_hbm [thread:$0]  (%p3381_p7), %s3268_s9, 1024, %s3266_s24, %s3274_s12, %s2527_s18, %s2527_s18, %s2528_s7  }
 0x2d8 PF: > { %s3382_s14 = sld [smem:[#allocation16_spill]]  ;;  %p2026_p11 = scmp.ge.s32.totalorder %s2517_s11, 2 }
 0x2d9   : > { %s3383_s16 = sld [smem:[#allocation20_spill]] }
 0x2de   : > { %s1478_s27 = sand.u32 1, %s3382_s14  }
 0x2df   : > { %p3384_p4 = scmp.ne.s32.totalorder %s3383_s16, 0  ;;  %s1479_s1 = scalar_lea.sflag [#allocation5], %s1478_s27 }
 0x2e1   : > { %p2016_p13 = pnand %p2026_p11, %p3384_p4 }
 0x2e3   : > { %p2017_p8 = pneg %p2016_p13 }
 0x2e5   : > { %2472 = dma.done.wait (%p2017_p8), %s1479_s1, 1024  }
 0x2e6   : > { %2474 = vsyncadd (%p2017_p8), %s1479_s1, 4294966272  ;;  %s25_s11 = sadd.s32 1, %s2517_s11   ;;  %s3385_s30 = sld [smem:[#allocation18_spill]] }
 0x2e7   : > { %p22_p10 = scmp.ge.s32.totalorder %s25_s11, 10   ;;  %s3386_s9 = sld [smem:[#allocation21_spill]] }
 0x2e8   : > { %s3387_s12 = sld [smem:[#allocation22_spill]]  ;;  %s3388_s24 = smov %s2481_s25 }
 0x2e9   : > { %s3389_s25 = smov %s2485_s26  ;;  %s3390_s26 = smov %s2725_s3 }
 0x2ea   : > { %s3391_s27 = smov %s2493_s28  ;;  %s3392_s28 = smov %s2497_s29 }
 0x2eb   : > { %s3393_s29 = smov %s2720_s23  ;;  %s3394_s8 = smov %s2513_s10 }
 0x2ec   :  { %24 = sbr.rel (!%p22_p10) target bundleno = 16 (0x10), region = 114 }
 0x2ee   : > { %s3395_s10 = smov %s3387_s12 }
 0x2f1   :  { %1484 = vsyncpa [#allocation4], 1 }
 0x2f2   :  { %1486 = vsyncpa [#allocation4 + $0x1], 1 }
 0x2f3   :  { %1487 = vsyncpa [#allocation7], 1 }
 0x2f4   :  { %1488 = vsyncpa [#allocation10], 1 }
 0x2f5   :  { %1489 = vsyncpa [#allocation5], 1 }
 0x2f6   :  { %1491 = vsyncpa [#allocation5 + $0x1], 1 }

</bundles_post_ra>
